<compile_context>
chip_gen: v5e
topology: v5e:2x2
jax: 0.10.0
libtpu: 0.0.40
codegen_flags: <defaults>
</compile_context>

<pallas_src>
import functools

import jax
import jax.numpy as jnp
import numpy as np
from jax import lax
from jax.experimental import pallas as pl
from jax.experimental.pallas import tpu as pltpu

EPS = 1e-5


def _dwsep_kernel(top_ref, x_ref, bot_ref, wdw_ref, b1_ref, wpw_ref, b2_ref,
                  out_ref, xp_ref, *, pointwise_on_mxu, mm_dtype):
    # top_ref : (1, 1, W, Cin)   row just above this band (clamped; masked below)
    # x_ref   : (1, TH, W, Cin)  current row band (un-padded, native dtype)
    # bot_ref : (1, 1, W, Cin)   row just below this band (clamped; masked below)
    # wdw_ref : (3, 3, Cin)      depthwise 3x3 filter, BN1 scale pre-folded (f32)
    # b1_ref  : (1, Cin)         folded dw-bias + BN1 (eval)
    # wpw_ref : (Cin, Cout)      1x1 conv weight, BN2 scale pre-folded
    # b2_ref  : (1, Cout)        folded pw-bias + BN2 (eval)
    # out_ref : (1, TH, W, Cout)
    # xp_ref  : (TH+2, Wp, Cin)  VMEM scratch, Wp = roundup(W+2, 8)
    TH = x_ref.shape[1]
    W = x_ref.shape[2]
    Cin = x_ref.shape[3]
    Cout = out_ref.shape[3]

    h = pl.program_id(1)
    nb = pl.num_programs(1)
    top_valid = (h > 0).astype(jnp.float32)        # top image border -> zeros
    bot_valid = (h < nb - 1).astype(jnp.float32)   # bottom image border -> zeros

    # ---- assemble the zero-padded band in VMEM (no HBM pad pass) ----
    # Columns >= W+2 of the aligned scratch are never read, so left un-touched.
    zcol = jnp.zeros((TH + 2, 1, Cin), jnp.float32)
    xp_ref[:, pl.ds(0, 1), :] = zcol                       # left border
    xp_ref[:, pl.ds(W + 1, 1), :] = zcol                   # right border
    xp_ref[pl.ds(0, 1), pl.ds(1, W), :] = (
        top_ref[0].astype(jnp.float32) * top_valid)        # halo row above
    xp_ref[pl.ds(TH + 1, 1), pl.ds(1, W), :] = (
        bot_ref[0].astype(jnp.float32) * bot_valid)        # halo row below
    xp_ref[pl.ds(1, TH), pl.ds(1, W), :] = x_ref[0].astype(jnp.float32)

    # ---- depthwise 3x3, stride 1 ----
    # Hoist the 3 width-shifted slabs once (3 sublane realignments, not 9);
    # the ky shifts are leading-dim slices (free vreg selection).
    x_l = xp_ref[:, pl.ds(0, W), :]                        # (TH+2, W, Cin)
    x_c = xp_ref[:, pl.ds(1, W), :]
    x_r = xp_ref[:, pl.ds(2, W), :]

    # Accumulator initialized from the first tap (no zeros pass).
    acc = x_l[0:TH] * wdw_ref[0, 0, :]
    acc = acc + x_c[0:TH] * wdw_ref[0, 1, :]
    acc = acc + x_r[0:TH] * wdw_ref[0, 2, :]
    for ky in range(1, 3):
        acc = acc + x_l[ky:ky + TH] * wdw_ref[ky, 0, :]
        acc = acc + x_c[ky:ky + TH] * wdw_ref[ky, 1, :]
        acc = acc + x_r[ky:ky + TH] * wdw_ref[ky, 2, :]

    # BN1 (scale folded into wdw) + ReLU.
    a = jnp.maximum(acc + b1_ref[0], 0.0)                  # (TH, W, Cin) f32

    # ---- pointwise 1x1 conv + BN2 + ReLU ----
    if pointwise_on_mxu:
        # Real channel counts: MXU matmul (bf16 operands on the fast path).
        # (TH, W, Cin) -> (TH*W, Cin) is layout-free when W % 8 == 0.
        a2 = a.reshape(TH * W, Cin).astype(mm_dtype)
        wpw = wpw_ref[...].astype(mm_dtype)
        z = jnp.dot(a2, wpw, preferred_element_type=jnp.float32)
        z = jnp.maximum(z + b2_ref[0], 0.0)                # (TH*W, Cout)
        out_ref[0] = z.reshape(TH, W, Cout).astype(out_ref.dtype)
    else:
        # Tiny Cin: skip the MXU, do Cin VPU FMAs instead.
        wpw = wpw_ref[...].astype(jnp.float32)             # (Cin, Cout)
        z = a[:, :, 0:1] * wpw[0]
        for ci in range(1, Cin):
            z = z + a[:, :, ci:ci + 1] * wpw[ci]
        z = jnp.maximum(z + b2_ref[0], 0.0)                # (TH, W, Cout)
        out_ref[0] = z.astype(out_ref.dtype)


def _round_up(x, m):
    return (x + m - 1) // m * m


def _vmem_capacity_bytes():
    """Per-core VMEM capacity; conservative fallback if the query is missing."""
    try:
        info = pltpu.get_tpu_info()
        cap = getattr(info, "vmem_capacity_bytes", None)
        if cap:
            return int(cap)
    except Exception:
        pass
    return 64 * 1024 * 1024     # v7x per-TensorCore VMEM (smallest generation)


def _pick_band_rows(N, H, W, cin, cout, in_bytes, out_bytes):
    """Largest divisor of H whose band fits the per-generation VMEM budget."""
    cap_bytes = _vmem_capacity_bytes()
    # Headroom for compiler scratch / weight blocks / semaphores.
    budget = min(cap_bytes // 3, 48 * 1024 * 1024)
    wp = _round_up(W + 2, 8)
    per_row = (W * (2 * cin * in_bytes              # double-buffered input band
                    + 2 * cout * out_bytes)         # double-buffered output band
               + 4 * (wp * cin                      # padded f32 scratch
                      + W * (4 * cin + 2 * cout)))  # live f32 temporaries
    cap_rows = max(1, budget // max(per_row, 1))
    if N == 1:
        # >= 2 grid steps so both TensorCores (v7x) / the pipeline get work.
        cap_rows = min(cap_rows, max(H // 2, 1))
    best = 1
    for th in range(1, H + 1):
        if H % th == 0 and th <= cap_rows:
            best = th
    return best


def depthwise_separable_conv_nhwc(x_nhwc, p, band_rows=None, matmul_dtype=None,
                                  out_dtype=None, pointwise_on_mxu=None):
    """NHWC fast path (no layout transposes). x_nhwc: (N, H, W, Cin)."""
    N, H, W, Cin = x_nhwc.shape
    Cout = p["w_pw"].shape[0]
    in_dtype = x_nhwc.dtype
    out_dtype = in_dtype if out_dtype is None else out_dtype
    if matmul_dtype is None:
        # bf16 operands are the native/fast MXU path on v5e/v6e/v7x; keep f32
        # operands only when the caller feeds f32 activations (accuracy).
        matmul_dtype = jnp.bfloat16 if in_dtype == jnp.bfloat16 else jnp.float32
    if pointwise_on_mxu is None:
        # TODO(synk): the MXU-vs-VPU crossover should be measured per chip
        # (4x128^2 on v5e vs 2x256^2 on v6e/v7x); Cin > 16 is a safe default.
        pointwise_on_mxu = Cin > 16

    in_bytes = np.dtype(in_dtype).itemsize
    out_bytes = np.dtype(out_dtype).itemsize
    TH = band_rows if band_rows is not None else _pick_band_rows(
        N, H, W, Cin, Cout, in_bytes, out_bytes)
    assert H % TH == 0, "band_rows must divide H"
    nb = H // TH
    Wp = _round_up(W + 2, 8)

    # --- parameter folding (plain JAX glue on tiny arrays; eval-mode BN) ---
    f32 = jnp.float32
    s1 = p["g1"].astype(f32) / jnp.sqrt(p["rv1"].astype(f32) + EPS)     # (Cin,)
    w_dw = jnp.transpose(p["w_dw"].astype(f32)[:, 0, :, :], (1, 2, 0)) * s1
    bias1 = ((p["b_dw"].astype(f32) - p["rm1"].astype(f32)) * s1
             + p["b1"].astype(f32)).reshape(1, Cin)
    s2 = p["g2"].astype(f32) / jnp.sqrt(p["rv2"].astype(f32) + EPS)     # (Cout,)
    w_pw = (jnp.transpose(p["w_pw"].astype(f32)[:, :, 0, 0], (1, 0))
            * s2[None, :])                                              # (Cin,Cout)
    bias2 = ((p["b_pw"].astype(f32) - p["rm2"].astype(f32)) * s2
             + p["b2"].astype(f32)).reshape(1, Cout)
    if pointwise_on_mxu:
        w_pw = w_pw.astype(matmul_dtype)        # halve the weight block DMA

    kernel = functools.partial(_dwsep_kernel,
                               pointwise_on_mxu=pointwise_on_mxu,
                               mm_dtype=matmul_dtype)

    band_spec = pl.BlockSpec((1, TH, W, Cin), lambda n, h: (n, h, 0, 0))
    # Halo rows: block size 1 along H, so the block index is the row index.
    # Clamp at image top/bottom; the kernel masks those rows to zero.
    top_spec = pl.BlockSpec(
        (1, 1, W, Cin), lambda n, h: (n, jnp.maximum(h * TH - 1, 0), 0, 0))
    bot_spec = pl.BlockSpec(
        (1, 1, W, Cin), lambda n, h: (n, jnp.minimum(h * TH + TH, H - 1), 0, 0))

    vmem_limit = int(min(64 * 1024 * 1024, (_vmem_capacity_bytes() * 3) // 4))

    return pl.pallas_call(
        kernel,
        out_shape=jax.ShapeDtypeStruct((N, H, W, Cout), out_dtype),
        grid_spec=pltpu.PrefetchScalarGridSpec(
            num_scalar_prefetch=0,
            grid=(N, nb),
            in_specs=[
                top_spec,
                band_spec,
                bot_spec,
                pl.BlockSpec((3, 3, Cin), lambda n, h: (0, 0, 0)),
                pl.BlockSpec((1, Cin), lambda n, h: (0, 0)),
                pl.BlockSpec((Cin, Cout), lambda n, h: (0, 0)),
                pl.BlockSpec((1, Cout), lambda n, h: (0, 0)),
            ],
            out_specs=pl.BlockSpec((1, TH, W, Cout), lambda n, h: (n, h, 0, 0)),
            scratch_shapes=[pltpu.VMEM((TH + 2, Wp, Cin), jnp.float32)],
        ),
        compiler_params=pltpu.CompilerParams(
            dimension_semantics=("parallel", "parallel"),
            vmem_limit_bytes=vmem_limit),
    )(x_nhwc, x_nhwc, x_nhwc, w_dw, bias1, w_pw, bias2)


def depthwise_separable_conv(x_nchw, p, band_rows=None, matmul_dtype=None,
                             out_dtype=None, pointwise_on_mxu=None):
    """PyTorch-compatible entry point. x_nchw: (N, Cin, H, W)."""
    # NCHW <-> NHWC transposes only exist to match the PyTorch API; a model
    # that stays NHWC should call depthwise_separable_conv_nhwc directly.
    x_nhwc = jnp.transpose(x_nchw, (0, 2, 3, 1))
    out_nhwc = depthwise_separable_conv_nhwc(
        x_nhwc, p, band_rows=band_rows, matmul_dtype=matmul_dtype,
        out_dtype=out_dtype, pointwise_on_mxu=pointwise_on_mxu)
    return jnp.transpose(out_nhwc, (0, 3, 1, 2))


def reference(x, p):
    """Pure-JAX reference of the PyTorch forward (eval-mode BN), f32."""
    Cin = x.shape[1]
    y = lax.conv_general_dilated(
        x, p["w_dw"], (1, 1), ((1, 1), (1, 1)),
        dimension_numbers=("NCHW", "OIHW", "NCHW"), feature_group_count=Cin)
    y = y + p["b_dw"][None, :, None, None]
    y = ((y - p["rm1"][None, :, None, None])
         / jnp.sqrt(p["rv1"][None, :, None, None] + EPS)
         * p["g1"][None, :, None, None] + p["b1"][None, :, None, None])
    y = jnp.maximum(y, 0.0)
    z = lax.conv_general_dilated(
        y, p["w_pw"], (1, 1), ((0, 0), (0, 0)),
        dimension_numbers=("NCHW", "OIHW", "NCHW"))
    z = z + p["b_pw"][None, :, None, None]
    z = ((z - p["rm2"][None, :, None, None])
         / jnp.sqrt(p["rv2"][None, :, None, None] + EPS)
         * p["g2"][None, :, None, None] + p["b2"][None, :, None, None])
    return jnp.maximum(z, 0.0)


def make_params(key, cin, cout):
    ks = jax.random.split(key, 8)
    f32 = jnp.float32
    return {
        # depthwise conv: Conv2d(cin, cin, 3, groups=cin)
        "w_dw": 0.2 * jax.random.normal(ks[0], (cin, 1, 3, 3), f32),
        "b_dw": 0.1 * jax.random.normal(ks[1], (cin,), f32),
        # BatchNorm2d(cin)
        "g1": 1.0 + 0.1 * jax.random.normal(ks[2], (cin,), f32),
        "b1": 0.1 * jax.random.normal(ks[3], (cin,), f32),
        "rm1": 0.05 * jax.random.normal(ks[4], (cin,), f32),
        "rv1": 0.5 + jnp.abs(0.2 * jax.random.normal(ks[5], (cin,), f32)),
        # pointwise conv: Conv2d(cin, cout, 1)
        "w_pw": 0.2 * jax.random.normal(ks[6], (cout, cin, 1, 1), f32),
        "b_pw": 0.1 * jax.random.normal(ks[7], (cout,), f32),
        # BatchNorm2d(cout)
        "g2": jnp.linspace(0.8, 1.2, cout, dtype=f32),
        "b2": jnp.linspace(-0.1, 0.1, cout, dtype=f32),
        "rm2": jnp.linspace(-0.05, 0.05, cout, dtype=f32),
        "rv2": jnp.linspace(0.6, 1.4, cout, dtype=f32),
    }


if __name__ == "__main__":
    key = jax.random.PRNGKey(0)
    kx, kp, kx2, kp2, kx3, kp3 = jax.random.split(key, 6)

    # Test 1: tiny channel counts -> VPU pointwise path. Default band sizing
    # gives a whole-image band per batch element (grid = (2, 1)).
    N, Cin, H, W, Cout = 2, 4, 16, 16, 8
    x = jax.random.normal(kx, (N, Cin, H, W), jnp.float32)
    params = make_params(kp, Cin, Cout)
    ref = jax.block_until_ready(reference(x, params))
    out = jax.block_until_ready(depthwise_separable_conv(x, params))
    np.testing.assert_allclose(np.asarray(out), np.asarray(ref),
                               rtol=1e-4, atol=1e-4)
    # Same case with forced small bands (exercises the inter-band halo path).
    out_b = jax.block_until_ready(depthwise_separable_conv(x, params,
                                                           band_rows=4))
    np.testing.assert_allclose(np.asarray(out_b), np.asarray(ref),
                               rtol=1e-4, atol=1e-4)

    # Test 2: wider channels -> MXU pointwise path, batch 1 -> 2 row bands
    # (>= 2 grid steps; halos between bands exercised with the MXU path).
    N2, Cin2, H2, W2, Cout2 = 1, 32, 16, 16, 16
    x2 = jax.random.normal(kx2, (N2, Cin2, H2, W2), jnp.float32)
    params2 = make_params(kp2, Cin2, Cout2)
    out2 = jax.block_until_ready(depthwise_separable_conv(x2, params2))
    ref2 = jax.block_until_ready(reference(x2, params2))
    np.testing.assert_allclose(np.asarray(out2), np.asarray(ref2),
                               rtol=5e-4, atol=5e-4)

    # Test 3: bf16 I/O + bf16 MXU operands (the production fast path).
    N3, Cin3, H3, W3, Cout3 = 1, 32, 16, 16, 64
    x3 = jax.random.normal(kx3, (N3, Cin3, H3, W3),
                           jnp.float32).astype(jnp.bfloat16)
    params3 = make_params(kp3, Cin3, Cout3)
    out3 = jax.block_until_ready(depthwise_separable_conv(x3, params3))
    ref3 = jax.block_until_ready(reference(x3.astype(jnp.float32), params3))
    np.testing.assert_allclose(np.asarray(out3.astype(jnp.float32)),
                               np.asarray(ref3), rtol=1e-1, atol=1e-1)

    print("KERNEL_OK")
</pallas_src>

<mosaic_0001>
module attributes {stable_mosaic.version = 11 : i64} {
  func.func @_dwsep_kernel(%arg0: i32, %arg1: i32, %arg2: memref<1x1x16x4xf32, #tpu.memory_space<vmem>>, %arg3: memref<1x16x16x4xf32, #tpu.memory_space<vmem>>, %arg4: memref<1x1x16x4xf32, #tpu.memory_space<vmem>>, %arg5: memref<3x3x4xf32, #tpu.memory_space<vmem>>, %arg6: memref<1x4xf32, #tpu.memory_space<vmem>>, %arg7: memref<4x8xf32, #tpu.memory_space<vmem>>, %arg8: memref<1x8xf32, #tpu.memory_space<vmem>>, %arg9: memref<1x16x16x8xf32, #tpu.memory_space<vmem>>, %arg10: memref<18x24x4xf32, #tpu.memory_space<vmem>>) attributes {dimension_semantics = [#tpu.dimension_semantics<parallel>, #tpu.dimension_semantics<parallel>], iteration_bounds = array<i64: 2, 1>, scalar_prefetch = 0 : i64, scratch_operands = 1 : i64, tpu.core_type = #tpu.core_type<tc>, window_params = [{transform_indices = @transform_0, window_bounds = array<i64: 1, 1, 16, 4>}, {transform_indices = @transform_1, window_bounds = array<i64: 1, 16, 16, 4>}, {transform_indices = @transform_2, window_bounds = array<i64: 1, 1, 16, 4>}, {pipeline_mode = #tpu.pipeline_mode<synchronous>, transform_indices = @transform_3, window_bounds = array<i64: 3, 3, 4>}, {pipeline_mode = #tpu.pipeline_mode<synchronous>, transform_indices = @transform_4, window_bounds = array<i64: 1, 4>}, {pipeline_mode = #tpu.pipeline_mode<synchronous>, transform_indices = @transform_5, window_bounds = array<i64: 4, 8>}, {pipeline_mode = #tpu.pipeline_mode<synchronous>, transform_indices = @transform_6, window_bounds = array<i64: 1, 8>}, {transform_indices = @transform_7, window_bounds = array<i64: 1, 16, 16, 8>}]} {
    %c0_i32 = arith.constant 0 : i32
    %0 = arith.cmpi sgt, %arg1, %c0_i32 : i32
    %1 = arith.extui %0 : i1 to i32
    %2 = arith.sitofp %1 : i32 to f32
    %c0_i32_0 = arith.constant 0 : i32
    %3 = arith.cmpi slt, %arg1, %c0_i32_0 : i32
    %4 = arith.extui %3 : i1 to i32
    %5 = arith.sitofp %4 : i32 to f32
    %cst = arith.constant 0.000000e+00 : f32
    %6 = vector.broadcast %cst : f32 to vector<18x1x4xf32>
    %c0 = arith.constant 0 : index
    %c0_1 = arith.constant 0 : index
    %c0_2 = arith.constant 0 : index
    %7 = vector.load %arg10[%c0, %c0_1, %c0_2] : memref<18x24x4xf32, #tpu.memory_space<vmem>>, vector<18x1x4xf32>
    tpu.vector_store %arg10[%c0, %c0_1, %c0_2], %6 {strides = array<i32>} : memref<18x24x4xf32, #tpu.memory_space<vmem>>, vector<18x1x4xf32>,
    %c0_3 = arith.constant 0 : index
    %c17 = arith.constant 17 : index
    %c0_4 = arith.constant 0 : index
    %8 = vector.load %arg10[%c0_3, %c17, %c0_4] : memref<18x24x4xf32, #tpu.memory_space<vmem>>, vector<18x1x4xf32>
    tpu.vector_store %arg10[%c0_3, %c17, %c0_4], %6 {strides = array<i32>} : memref<18x24x4xf32, #tpu.memory_space<vmem>>, vector<18x1x4xf32>,
    %c0_5 = arith.constant 0 : index
    %c0_6 = arith.constant 0 : index
    %c0_7 = arith.constant 0 : index
    %c0_8 = arith.constant 0 : index
    %9 = vector.load %arg2[%c0_5, %c0_6, %c0_7, %c0_8] : memref<1x1x16x4xf32, #tpu.memory_space<vmem>>, vector<1x1x16x4xf32>
    %10 = vector.shape_cast %9 : vector<1x1x16x4xf32> to vector<1x16x4xf32>
    %11 = vector.broadcast %2 : f32 to vector<1x16x4xf32>
    %12 = arith.mulf %10, %11 : vector<1x16x4xf32>
    %c0_9 = arith.constant 0 : index
    %c1 = arith.constant 1 : index
    %c0_10 = arith.constant 0 : index
    %13 = vector.load %arg10[%c0_9, %c1, %c0_10] : memref<18x24x4xf32, #tpu.memory_space<vmem>>, vector<1x16x4xf32>
    tpu.vector_store %arg10[%c0_9, %c1, %c0_10], %12 {strides = array<i32>} : memref<18x24x4xf32, #tpu.memory_space<vmem>>, vector<1x16x4xf32>,
    %c0_11 = arith.constant 0 : index
    %c0_12 = arith.constant 0 : index
    %c0_13 = arith.constant 0 : index
    %c0_14 = arith.constant 0 : index
    %14 = vector.load %arg4[%c0_11, %c0_12, %c0_13, %c0_14] : memref<1x1x16x4xf32, #tpu.memory_space<vmem>>, vector<1x1x16x4xf32>
    %15 = vector.shape_cast %14 : vector<1x1x16x4xf32> to vector<1x16x4xf32>
    %16 = vector.broadcast %5 : f32 to vector<1x16x4xf32>
    %17 = arith.mulf %15, %16 : vector<1x16x4xf32>
    %c17_15 = arith.constant 17 : index
    %c1_16 = arith.constant 1 : index
    %c0_17 = arith.constant 0 : index
    %18 = vector.load %arg10[%c17_15, %c1_16, %c0_17] : memref<18x24x4xf32, #tpu.memory_space<vmem>>, vector<1x16x4xf32>
    tpu.vector_store %arg10[%c17_15, %c1_16, %c0_17], %17 {strides = array<i32>} : memref<18x24x4xf32, #tpu.memory_space<vmem>>, vector<1x16x4xf32>,
    %c0_18 = arith.constant 0 : index
    %c0_19 = arith.constant 0 : index
    %c0_20 = arith.constant 0 : index
    %c0_21 = arith.constant 0 : index
    %19 = vector.load %arg3[%c0_18, %c0_19, %c0_20, %c0_21] : memref<1x16x16x4xf32, #tpu.memory_space<vmem>>, vector<1x16x16x4xf32>
    %20 = vector.shape_cast %19 : vector<1x16x16x4xf32> to vector<16x16x4xf32>
    %c1_22 = arith.constant 1 : index
    %c1_23 = arith.constant 1 : index
    %c0_24 = arith.constant 0 : index
    %21 = vector.load %arg10[%c1_22, %c1_23, %c0_24] : memref<18x24x4xf32, #tpu.memory_space<vmem>>, vector<16x16x4xf32>
    tpu.vector_store %arg10[%c1_22, %c1_23, %c0_24], %20 {strides = array<i32>} : memref<18x24x4xf32, #tpu.memory_space<vmem>>, vector<16x16x4xf32>,
    %c0_25 = arith.constant 0 : index
    %c0_26 = arith.constant 0 : index
    %c0_27 = arith.constant 0 : index
    %22 = vector.load %arg10[%c0_25, %c0_26, %c0_27] : memref<18x24x4xf32, #tpu.memory_space<vmem>>, vector<18x16x4xf32>
    %c0_28 = arith.constant 0 : index
    %c1_29 = arith.constant 1 : index
    %c0_30 = arith.constant 0 : index
    %23 = vector.load %arg10[%c0_28, %c1_29, %c0_30] : memref<18x24x4xf32, #tpu.memory_space<vmem>>, vector<18x16x4xf32>
    %c0_31 = arith.constant 0 : index
    %c2 = arith.constant 2 : index
    %c0_32 = arith.constant 0 : index
    %24 = vector.load %arg10[%c0_31, %c2, %c0_32] : memref<18x24x4xf32, #tpu.memory_space<vmem>>, vector<18x16x4xf32>
    %25 = vector.extract_strided_slice %22 {offsets = [0, 0, 0], sizes = [16, 16, 4], strides = [1, 1, 1]} : vector<18x16x4xf32> to vector<16x16x4xf32>
    %c0_33 = arith.constant 0 : index
    %c0_34 = arith.constant 0 : index
    %c0_35 = arith.constant 0 : index
    %26 = vector.load %arg5[%c0_33, %c0_34, %c0_35] : memref<3x3x4xf32, #tpu.memory_space<vmem>>, vector<1x1x4xf32>
    %27 = vector.shape_cast %26 : vector<1x1x4xf32> to vector<4xf32>
    %28 = vector.shape_cast %27 : vector<4xf32> to vector<1x1x4xf32>
    %29 = vector.broadcast %28 : vector<1x1x4xf32> to vector<16x16x4xf32>
    %30 = arith.mulf %25, %29 : vector<16x16x4xf32>
    %31 = vector.extract_strided_slice %23 {offsets = [0, 0, 0], sizes = [16, 16, 4], strides = [1, 1, 1]} : vector<18x16x4xf32> to vector<16x16x4xf32>
    %c0_36 = arith.constant 0 : index
    %c1_37 = arith.constant 1 : index
    %c0_38 = arith.constant 0 : index
    %32 = vector.load %arg5[%c0_36, %c1_37, %c0_38] : memref<3x3x4xf32, #tpu.memory_space<vmem>>, vector<1x1x4xf32>
    %33 = vector.shape_cast %32 : vector<1x1x4xf32> to vector<4xf32>
    %34 = vector.shape_cast %33 : vector<4xf32> to vector<1x1x4xf32>
    %35 = vector.broadcast %34 : vector<1x1x4xf32> to vector<16x16x4xf32>
    %36 = arith.mulf %31, %35 : vector<16x16x4xf32>
    %37 = arith.addf %30, %36 : vector<16x16x4xf32>
    %38 = vector.extract_strided_slice %24 {offsets = [0, 0, 0], sizes = [16, 16, 4], strides = [1, 1, 1]} : vector<18x16x4xf32> to vector<16x16x4xf32>
    %c0_39 = arith.constant 0 : index
    %c2_40 = arith.constant 2 : index
    %c0_41 = arith.constant 0 : index
    %39 = vector.load %arg5[%c0_39, %c2_40, %c0_41] : memref<3x3x4xf32, #tpu.memory_space<vmem>>, vector<1x1x4xf32>
    %40 = vector.shape_cast %39 : vector<1x1x4xf32> to vector<4xf32>
    %41 = vector.shape_cast %40 : vector<4xf32> to vector<1x1x4xf32>
    %42 = vector.broadcast %41 : vector<1x1x4xf32> to vector<16x16x4xf32>
    %43 = arith.mulf %38, %42 : vector<16x16x4xf32>
    %44 = arith.addf %37, %43 : vector<16x16x4xf32>
    %45 = vector.extract_strided_slice %22 {offsets = [1, 0, 0], sizes = [16, 16, 4], strides = [1, 1, 1]} : vector<18x16x4xf32> to vector<16x16x4xf32>
    %c1_42 = arith.constant 1 : index
    %c0_43 = arith.constant 0 : index
    %c0_44 = arith.constant 0 : index
    %46 = vector.load %arg5[%c1_42, %c0_43, %c0_44] : memref<3x3x4xf32, #tpu.memory_space<vmem>>, vector<1x1x4xf32>
    %47 = vector.shape_cast %46 : vector<1x1x4xf32> to vector<4xf32>
    %48 = vector.shape_cast %47 : vector<4xf32> to vector<1x1x4xf32>
    %49 = vector.broadcast %48 : vector<1x1x4xf32> to vector<16x16x4xf32>
    %50 = arith.mulf %45, %49 : vector<16x16x4xf32>
    %51 = arith.addf %44, %50 : vector<16x16x4xf32>
    %52 = vector.extract_strided_slice %23 {offsets = [1, 0, 0], sizes = [16, 16, 4], strides = [1, 1, 1]} : vector<18x16x4xf32> to vector<16x16x4xf32>
    %c1_45 = arith.constant 1 : index
    %c1_46 = arith.constant 1 : index
    %c0_47 = arith.constant 0 : index
    %53 = vector.load %arg5[%c1_45, %c1_46, %c0_47] : memref<3x3x4xf32, #tpu.memory_space<vmem>>, vector<1x1x4xf32>
    %54 = vector.shape_cast %53 : vector<1x1x4xf32> to vector<4xf32>
    %55 = vector.shape_cast %54 : vector<4xf32> to vector<1x1x4xf32>
    %56 = vector.broadcast %55 : vector<1x1x4xf32> to vector<16x16x4xf32>
    %57 = arith.mulf %52, %56 : vector<16x16x4xf32>
    %58 = arith.addf %51, %57 : vector<16x16x4xf32>
    %59 = vector.extract_strided_slice %24 {offsets = [1, 0, 0], sizes = [16, 16, 4], strides = [1, 1, 1]} : vector<18x16x4xf32> to vector<16x16x4xf32>
    %c1_48 = arith.constant 1 : index
    %c2_49 = arith.constant 2 : index
    %c0_50 = arith.constant 0 : index
    %60 = vector.load %arg5[%c1_48, %c2_49, %c0_50] : memref<3x3x4xf32, #tpu.memory_space<vmem>>, vector<1x1x4xf32>
    %61 = vector.shape_cast %60 : vector<1x1x4xf32> to vector<4xf32>
    %62 = vector.shape_cast %61 : vector<4xf32> to vector<1x1x4xf32>
    %63 = vector.broadcast %62 : vector<1x1x4xf32> to vector<16x16x4xf32>
    %64 = arith.mulf %59, %63 : vector<16x16x4xf32>
    %65 = arith.addf %58, %64 : vector<16x16x4xf32>
    %66 = vector.extract_strided_slice %22 {offsets = [2, 0, 0], sizes = [16, 16, 4], strides = [1, 1, 1]} : vector<18x16x4xf32> to vector<16x16x4xf32>
    %c2_51 = arith.constant 2 : index
    %c0_52 = arith.constant 0 : index
    %c0_53 = arith.constant 0 : index
    %67 = vector.load %arg5[%c2_51, %c0_52, %c0_53] : memref<3x3x4xf32, #tpu.memory_space<vmem>>, vector<1x1x4xf32>
    %68 = vector.shape_cast %67 : vector<1x1x4xf32> to vector<4xf32>
    %69 = vector.shape_cast %68 : vector<4xf32> to vector<1x1x4xf32>
    %70 = vector.broadcast %69 : vector<1x1x4xf32> to vector<16x16x4xf32>
    %71 = arith.mulf %66, %70 : vector<16x16x4xf32>
    %72 = arith.addf %65, %71 : vector<16x16x4xf32>
    %73 = vector.extract_strided_slice %23 {offsets = [2, 0, 0], sizes = [16, 16, 4], strides = [1, 1, 1]} : vector<18x16x4xf32> to vector<16x16x4xf32>
    %c2_54 = arith.constant 2 : index
    %c1_55 = arith.constant 1 : index
    %c0_56 = arith.constant 0 : index
    %74 = vector.load %arg5[%c2_54, %c1_55, %c0_56] : memref<3x3x4xf32, #tpu.memory_space<vmem>>, vector<1x1x4xf32>
    %75 = vector.shape_cast %74 : vector<1x1x4xf32> to vector<4xf32>
    %76 = vector.shape_cast %75 : vector<4xf32> to vector<1x1x4xf32>
    %77 = vector.broadcast %76 : vector<1x1x4xf32> to vector<16x16x4xf32>
    %78 = arith.mulf %73, %77 : vector<16x16x4xf32>
    %79 = arith.addf %72, %78 : vector<16x16x4xf32>
    %80 = vector.extract_strided_slice %24 {offsets = [2, 0, 0], sizes = [16, 16, 4], strides = [1, 1, 1]} : vector<18x16x4xf32> to vector<16x16x4xf32>
    %c2_57 = arith.constant 2 : index
    %c2_58 = arith.constant 2 : index
    %c0_59 = arith.constant 0 : index
    %81 = vector.load %arg5[%c2_57, %c2_58, %c0_59] : memref<3x3x4xf32, #tpu.memory_space<vmem>>, vector<1x1x4xf32>
    %82 = vector.shape_cast %81 : vector<1x1x4xf32> to vector<4xf32>
    %83 = vector.shape_cast %82 : vector<4xf32> to vector<1x1x4xf32>
    %84 = vector.broadcast %83 : vector<1x1x4xf32> to vector<16x16x4xf32>
    %85 = arith.mulf %80, %84 : vector<16x16x4xf32>
    %86 = arith.addf %79, %85 : vector<16x16x4xf32>
    %c0_60 = arith.constant 0 : index
    %c0_61 = arith.constant 0 : index
    %87 = vector.load %arg6[%c0_60, %c0_61] : memref<1x4xf32, #tpu.memory_space<vmem>>, vector<1x4xf32>
    %88 = vector.shape_cast %87 : vector<1x4xf32> to vector<4xf32>
    %89 = vector.shape_cast %88 : vector<4xf32> to vector<1x1x4xf32>
    %90 = vector.broadcast %89 : vector<1x1x4xf32> to vector<16x16x4xf32>
    %91 = arith.addf %86, %90 : vector<16x16x4xf32>
    %cst_62 = arith.constant 0.000000e+00 : f32
    %92 = vector.broadcast %cst_62 : f32 to vector<16x16x4xf32>
    %93 = arith.maximumf %91, %92 : vector<16x16x4xf32>
    %c0_63 = arith.constant 0 : index
    %c0_64 = arith.constant 0 : index
    %94 = vector.load %arg7[%c0_63, %c0_64] : memref<4x8xf32, #tpu.memory_space<vmem>>, vector<4x8xf32>
    %95 = vector.extract_strided_slice %93 {offsets = [0, 0, 0], sizes = [16, 16, 1], strides = [1, 1, 1]} : vector<16x16x4xf32> to vector<16x16x1xf32>
    %96 = vector.extract_strided_slice %94 {offsets = [0, 0], sizes = [1, 8], strides = [1, 1]} : vector<4x8xf32> to vector<1x8xf32>
    %97 = vector.shape_cast %96 : vector<1x8xf32> to vector<8xf32>
    %98 = vector.shape_cast %97 : vector<8xf32> to vector<1x1x8xf32>
    %99 = vector.broadcast %95 : vector<16x16x1xf32> to vector<16x16x8xf32>
    %100 = vector.broadcast %98 : vector<1x1x8xf32> to vector<16x16x8xf32>
    %101 = arith.mulf %99, %100 : vector<16x16x8xf32>
    %102 = vector.extract_strided_slice %93 {offsets = [0, 0, 1], sizes = [16, 16, 1], strides = [1, 1, 1]} : vector<16x16x4xf32> to vector<16x16x1xf32>
    %103 = vector.extract_strided_slice %94 {offsets = [1, 0], sizes = [1, 8], strides = [1, 1]} : vector<4x8xf32> to vector<1x8xf32>
    %104 = vector.shape_cast %103 : vector<1x8xf32> to vector<8xf32>
    %105 = vector.shape_cast %104 : vector<8xf32> to vector<1x1x8xf32>
    %106 = vector.broadcast %102 : vector<16x16x1xf32> to vector<16x16x8xf32>
    %107 = vector.broadcast %105 : vector<1x1x8xf32> to vector<16x16x8xf32>
    %108 = arith.mulf %106, %107 : vector<16x16x8xf32>
    %109 = arith.addf %101, %108 : vector<16x16x8xf32>
    %110 = vector.extract_strided_slice %93 {offsets = [0, 0, 2], sizes = [16, 16, 1], strides = [1, 1, 1]} : vector<16x16x4xf32> to vector<16x16x1xf32>
    %111 = vector.extract_strided_slice %94 {offsets = [2, 0], sizes = [1, 8], strides = [1, 1]} : vector<4x8xf32> to vector<1x8xf32>
    %112 = vector.shape_cast %111 : vector<1x8xf32> to vector<8xf32>
    %113 = vector.shape_cast %112 : vector<8xf32> to vector<1x1x8xf32>
    %114 = vector.broadcast %110 : vector<16x16x1xf32> to vector<16x16x8xf32>
    %115 = vector.broadcast %113 : vector<1x1x8xf32> to vector<16x16x8xf32>
    %116 = arith.mulf %114, %115 : vector<16x16x8xf32>
    %117 = arith.addf %109, %116 : vector<16x16x8xf32>
    %118 = vector.extract_strided_slice %93 {offsets = [0, 0, 3], sizes = [16, 16, 1], strides = [1, 1, 1]} : vector<16x16x4xf32> to vector<16x16x1xf32>
    %119 = vector.extract_strided_slice %94 {offsets = [3, 0], sizes = [1, 8], strides = [1, 1]} : vector<4x8xf32> to vector<1x8xf32>
    %120 = vector.shape_cast %119 : vector<1x8xf32> to vector<8xf32>
    %121 = vector.shape_cast %120 : vector<8xf32> to vector<1x1x8xf32>
    %122 = vector.broadcast %118 : vector<16x16x1xf32> to vector<16x16x8xf32>
    %123 = vector.broadcast %121 : vector<1x1x8xf32> to vector<16x16x8xf32>
    %124 = arith.mulf %122, %123 : vector<16x16x8xf32>
    %125 = arith.addf %117, %124 : vector<16x16x8xf32>
    %c0_65 = arith.constant 0 : index
    %c0_66 = arith.constant 0 : index
    %126 = vector.load %arg8[%c0_65, %c0_66] : memref<1x8xf32, #tpu.memory_space<vmem>>, vector<1x8xf32>
    %127 = vector.shape_cast %126 : vector<1x8xf32> to vector<8xf32>
    %128 = vector.shape_cast %127 : vector<8xf32> to vector<1x1x8xf32>
    %129 = vector.broadcast %128 : vector<1x1x8xf32> to vector<16x16x8xf32>
    %130 = arith.addf %125, %129 : vector<16x16x8xf32>
    %cst_67 = arith.constant 0.000000e+00 : f32
    %131 = vector.broadcast %cst_67 : f32 to vector<16x16x8xf32>
    %132 = arith.maximumf %130, %131 : vector<16x16x8xf32>
    %c0_68 = arith.constant 0 : index
    %c0_69 = arith.constant 0 : index
    %c0_70 = arith.constant 0 : index
    %c0_71 = arith.constant 0 : index
    %133 = vector.load %arg9[%c0_68, %c0_69, %c0_70, %c0_71] : memref<1x16x16x8xf32, #tpu.memory_space<vmem>>, vector<1x16x16x8xf32>
    %134 = vector.shape_cast %133 : vector<1x16x16x8xf32> to vector<16x16x8xf32>
    %135 = vector.shape_cast %132 : vector<16x16x8xf32> to vector<1x16x16x8xf32>
    tpu.vector_store %arg9[%c0_68, %c0_69, %c0_70, %c0_71], %135 {strides = array<i32>} : memref<1x16x16x8xf32, #tpu.memory_space<vmem>>, vector<1x16x16x8xf32>,
    return
  }
  func.func @transform_0(%arg0: i32, %arg1: i32) -> (i32, i32, i32, i32) {
    %c16_i32 = arith.constant 16 : i32
    %0 = arith.muli %arg1, %c16_i32 : i32
    %c1_i32 = arith.constant 1 : i32
    %1 = arith.subi %0, %c1_i32 : i32
    %c0_i32 = arith.constant 0 : i32
    %2 = arith.maxsi %1, %c0_i32 : i32
    %c0_i32_0 = arith.constant 0 : i32
    %c0_i32_1 = arith.constant 0 : i32
    %c0_i32_2 = arith.constant 0 : i32
    return %arg0, %2, %c0_i32_0, %c0_i32_1 : i32, i32, i32, i32
  }
  func.func @transform_1(%arg0: i32, %arg1: i32) -> (i32, i32, i32, i32) {
    %c0_i32 = arith.constant 0 : i32
    %c0_i32_0 = arith.constant 0 : i32
    %c0_i32_1 = arith.constant 0 : i32
    return %arg0, %arg1, %c0_i32, %c0_i32_0 : i32, i32, i32, i32
  }
  func.func @transform_2(%arg0: i32, %arg1: i32) -> (i32, i32, i32, i32) {
    %c16_i32 = arith.constant 16 : i32
    %0 = arith.muli %arg1, %c16_i32 : i32
    %c16_i32_0 = arith.constant 16 : i32
    %1 = arith.addi %0, %c16_i32_0 : i32
    %c15_i32 = arith.constant 15 : i32
    %2 = arith.minsi %1, %c15_i32 : i32
    %c0_i32 = arith.constant 0 : i32
    %c0_i32_1 = arith.constant 0 : i32
    %c0_i32_2 = arith.constant 0 : i32
    return %arg0, %2, %c0_i32, %c0_i32_1 : i32, i32, i32, i32
  }
  func.func @transform_3(%arg0: i32, %arg1: i32) -> (i32, i32, i32) {
    %c0_i32 = arith.constant 0 : i32
    %c0_i32_0 = arith.constant 0 : i32
    %c0_i32_1 = arith.constant 0 : i32
    %c0_i32_2 = arith.constant 0 : i32
    return %c0_i32, %c0_i32_0, %c0_i32_1 : i32, i32, i32
  }
  func.func @transform_4(%arg0: i32, %arg1: i32) -> (i32, i32) {
    %c0_i32 = arith.constant 0 : i32
    %c0_i32_0 = arith.constant 0 : i32
    %c0_i32_1 = arith.constant 0 : i32
    return %c0_i32, %c0_i32_0 : i32, i32
  }
  func.func @transform_5(%arg0: i32, %arg1: i32) -> (i32, i32) {
    %c0_i32 = arith.constant 0 : i32
    %c0_i32_0 = arith.constant 0 : i32
    %c0_i32_1 = arith.constant 0 : i32
    return %c0_i32, %c0_i32_0 : i32, i32
  }
  func.func @transform_6(%arg0: i32, %arg1: i32) -> (i32, i32) {
    %c0_i32 = arith.constant 0 : i32
    %c0_i32_0 = arith.constant 0 : i32
    %c0_i32_1 = arith.constant 0 : i32
    return %c0_i32, %c0_i32_0 : i32, i32
  }
  func.func @transform_7(%arg0: i32, %arg1: i32) -> (i32, i32, i32, i32) {
    %c0_i32 = arith.constant 0 : i32
    %c0_i32_0 = arith.constant 0 : i32
    %c0_i32_1 = arith.constant 0 : i32
    return %arg0, %arg1, %c0_i32, %c0_i32_0 : i32, i32, i32, i32
  }
}

</mosaic_0001>

<bundles_post_ra>
// kernel: tpu_custom_call.1
= control target key start
LH: loop header
LB: loop body
LE: loop exit
PB: predicated region body
PF: predicated region fallthrough
CT: control target
= control target key end

     0   :  { %s2481_s24 = smov 0   ;;  %s2483_s25 = smov 0   ;;  %s4283_s0 = inlined_call_operand.vmem [shape: f32[2,16,16,4], index: 0, kind: input, shape index: {}]   ;;  %s4284_s1 = inlined_call_operand.vmem [shape: f32[2,16,16,4], index: 1, kind: input, shape index: {}]   ;;  %s4285_s2 = inlined_call_operand.vmem [shape: f32[2,16,16,4], index: 2, kind: input, shape index: {}]   ;;  %s4286_s3 = inlined_call_operand.vmem [shape: f32[3,3,4], index: 3, kind: input, shape index: {}]   ;;  %s4287_s4 = inlined_call_operand.vmem [shape: f32[1,4], index: 4, kind: input, shape index: {}]   ;;  %s4288_s5 = inlined_call_operand.vmem [shape: f32[4,8], index: 5, kind: input, shape index: {}]   ;;  %s4289_s6 = inlined_call_operand.vmem [shape: f32[1,8], index: 6, kind: input, shape index: {}]   ;;  %s4290_s7 = inlined_call_operand.vmem [shape: f32[2,16,16,8], index: 7, kind: output, shape index: {}]  }
   0x1   :  { %s2485_s26 = smov 0  }
   0x2 LB: > { %s29_s27 = sadd.s32 1, %s2430_s25  ;;  %p2327_p0 = scmp.ge.s32.totalorder %s2434_s26, 1  ;;  %s2434_s26 = sphi %s2485_s26, %s17_s26   ;;  %s2430_s25 = sphi %s2483_s25, %s4429_s25   ;;  %s2426_s24 = sphi %s2481_s24, %s4428_s24  }
   0x3   : > { %p31_p1 = scmp.ge.s32.totalorder %s29_s27, 2  ;;  %p323_p2 = scmp.lt.s32.totalorder %s2434_s26, 3 }
   0x5   : > { %s4431_s27 = smov (%p31_p1, %s29_s27), 0  ;;  %p324_p3 = pnand %p2327_p0, %p323_p2 }
   0x7   : > { %327 = sbr.rel (%p324_p3) target bundleno = 606 (0x25e), region = 48 }
   0xc   : > { %p395_p4 = scmp.lt.s32.totalorder %s2426_s24, 1  ;;  %vm453_vm0 = vcmask 24576   ;;  %v2436_v0 = vmov 0   ;;  %v2437_v1 = vmov 0.0   ;;  %vm495_vm1 = vcmask 31744  }
   0xd   : > { %2381 = vset.pattern.permute.xlu0 %v2436_v0  ;;  %2380 = vset.pattern.permute.xlu2 %v2436_v0  ;;  %457 = vst.msk [vmem:[#allocation2 + $0x48] sm:$0x1] %vm453_vm0, %v2437_v1  ;;  %v2528_v8 = vld [vmem:[%s4286_s3] ss:$0 sm:$0xff]  ;;  %v2534_v9 = vld [vmem:[%s4286_s3 + $0x1] ss:$0 sm:$0xff] }
   0xe   : > { %2379 = vset.pattern.permute.xlu1 %v2436_v0  ;;  %s4433_s24 = smov (!%p395_p4, %s2426_s24), 1  ;;  %458 = vst.msk [vmem:[#allocation2 + $0x60] sm:$0x1] %vm453_vm0, %v2437_v1  ;;  %v2540_v10 = vld [vmem:[%s4286_s3 + $0x2] ss:$0 sm:$0xff]  ;;  %vm2152_vm2 = vcmask 64512  }
   0xf   : > { %459 = vst.msk [vmem:[#allocation2 + $0x78] sm:$0x1] %vm453_vm0, %v2437_v1  ;;  %s2505_s28 = sshll.u32 %s4433_s24, 8  ;;  %v2545_v11 = vld [vmem:[%s4286_s3 + $0x4] ss:$0 sm:$0xff] }
  0x10   : > { %s2511_s8 = scalar_lea.vmem %s4284_s1, %s2505_s28  ;;  %454 = vst.msk [vmem:[#allocation2] sm:$0x1] %vm453_vm0, %v2437_v1  ;;  %v2564_v17 = vld [vmem:[%s4286_s3 + $0x5] ss:$0 sm:$0xff]  ;;  %v2581_v23 = vld [vmem:[%s4286_s3 + $0x6] ss:$0 sm:$0xff]  ;;  %s403_s13 = scalar_lea.vmem %s4283_s0, %s2505_s28 }
  0x11   : > { %v510_v2 = vld [vmem:[%s2511_s8 + $0x20] sm:$0xff]  ;;  %v511_v3 = vld [vmem:[%s2511_s8 + $0x28] sm:$0xff]  ;;  %v512_v4 = vld [vmem:[%s2511_s8 + $0x30] sm:$0xff]  ;;  %455 = vst.msk [vmem:[#allocation2 + $0x18] sm:$0x1] %vm453_vm0, %v2437_v1  ;;  %s4092_s29 = scalar_lea.vmem %s4290_s7, %s2505_s28 }
  0x12   : > { %v513_v5 = vld [vmem:[%s2511_s8 + $0x38] sm:$0xff]  ;;  %543 = vst.msk [vmem:[#allocation2 + $0x49] sm:$0xff] %vm495_vm1, %v510_v2  ;;  %v514_v6 = vld [vmem:[%s2511_s8 + $0x40] sm:$0xff]  ;;  %v515_v7 = vld [vmem:[%s2511_s8 + $0x48] sm:$0xff] }
  0x13   : > { %544 = vst.msk [vmem:[#allocation2 + $0x51] sm:$0xff] %vm495_vm1, %v511_v3  ;;  %v2594_v27 = vld [vmem:[%s4286_s3 + $0x8] ss:$0 sm:$0xff]  ;;  %v2605_v31 = vld [vmem:[%s4286_s3 + $0x9] ss:$0 sm:$0xff] }
  0x14   : > { %545 = vst.msk [vmem:[#allocation2 + $0x61] sm:$0xff] %vm495_vm1, %v512_v4  ;;  %v2615_v35 = vld [vmem:[%s4286_s3 + $0xa] ss:$0 sm:$0xff]  ;;  %v2634_v42 = vld [vmem:[%s4287_s4] ss:$0 sm:$0xff] }
  0x15   : > { %546 = vst.msk [vmem:[#allocation2 + $0x69] sm:$0xff] %vm495_vm1, %v513_v5 }
  0x16   : > { %547 = vst.msk [vmem:[#allocation2 + $0x79] sm:$0xff] %vm495_vm1, %v514_v6 }
  0x17   : > { %548 = vst.msk [vmem:[#allocation2 + $0x81] sm:$0xff] %vm495_vm1, %v515_v7 }
  0x18   : > { %456 = vst.msk [vmem:[#allocation2 + $0x30] sm:$0x1] %vm453_vm0, %v2437_v1 }
  0x19   : > { %v2549_v12 = vld [vmem:[#allocation2 + $0x48] sm:$0xff]  ;;  %460 = vst.msk [vmem:[#allocation2 + $0x90] sm:$0x1] %vm453_vm0, %v2437_v1 }
  0x1a   : > { %v2551_v13 = vld [vmem:[#allocation2 + $0x49] sm:$0xff]  ;;  %v687_v15 = vmul.f32 %v2528_v8, %v2549_v12  ;;  %461 = vst.msk [vmem:[#allocation2 + $0xa8] sm:$0x1] %vm453_vm0, %v2437_v1  ;;  %v2677_v57 = vld [vmem:[#allocation2 + $0x51] sm:$0xff] }
  0x1b   : > { %v2555_v14 = vld [vmem:[#allocation2 + $0x4a] sm:$0xff]  ;;  %v721_v16 = vmul.f32 %v2534_v9, %v2551_v13  ;;  %v2568_v18 = vld [vmem:[#allocation2 + $0x60] sm:$0xff]  ;;  %462 = vst.msk [vmem:[#allocation2 + $0xc0] sm:$0x1] %vm453_vm0, %v2437_v1  ;;  %v722_v61 = vmul.f32 %v2534_v9, %v2677_v57 }
  0x1c   : > { %v2570_v19 = vld [vmem:[#allocation2 + $0x61] sm:$0xff]  ;;  %v787_v20 = vmul.f32 %v2540_v10, %v2555_v14  ;;  %v854_v22 = vmul.f32 %v2545_v11, %v2568_v18  ;;  %463 = vst.msk [vmem:[#allocation2 + $0xd8] sm:$0x1] %vm453_vm0, %v2437_v1  ;;  %v2642_v44 = vld [vmem:[#allocation2 + $0x69] sm:$0xff]  ;;  %v689_v62 = vmul.f32 %v2528_v8, %v2568_v18 }
  0x1d   : > { %v753_v21 = vadd.f32 %v721_v16, %v687_v15  ;;  %v2585_v24 = vld [vmem:[#allocation2 + $0x62] sm:$0xff]  ;;  %v920_v26 = vmul.f32 %v2564_v17, %v2570_v19  ;;  %464 = vst.msk [vmem:[#allocation2 + $0xf0] sm:$0x1] %vm453_vm0, %v2437_v1  ;;  %v581_v28 = vld [vmem:[#allocation2 + $0x78] sm:$0xff]  ;;  %v724_v48 = vmul.f32 %v2534_v9, %v2642_v44  ;;  %v723_v54 = vmul.f32 %v2534_v9, %v2570_v19  ;;  %v2683_v60 = vld [vmem:[#allocation2 + $0x50] sm:$0xff] }
  0x1e   : > { %465 = vst.msk [vmem:[#allocation2 + $0x108] sm:$0x1] %vm453_vm0, %v2437_v1  ;;  %v986_v30 = vmul.f32 %v2581_v23, %v2585_v24  ;;  %v617_v32 = vld [vmem:[#allocation2 + $0x79] sm:$0xff]  ;;  %v1053_v34 = vmul.f32 %v2594_v27, %v581_v28  ;;  %v2640_v43 = vld [vmem:[#allocation2 + $0x68] sm:$0xff]  ;;  %v691_v49 = vmul.f32 %v2528_v8, %v581_v28  ;;  %v789_v63 = vmul.f32 %v2540_v10, %v2585_v24 }
  0x1f   : > { %v819_v25 = vadd.f32 %v787_v20, %v753_v21  ;;  %466 = vst.msk [vmem:[#allocation2 + $0x120] sm:$0x1] %vm453_vm0, %v2437_v1  ;;  %v653_v36 = vld [vmem:[#allocation2 + $0x7a] sm:$0xff]  ;;  %v1119_v38 = vmul.f32 %v2605_v31, %v617_v32  ;;  %v690_v47 = vmul.f32 %v2528_v8, %v2640_v43  ;;  %v725_v50 = vmul.f32 %v2534_v9, %v617_v32  ;;  %v508_v20 = vld [vmem:[%s2511_s8 + $0x10] sm:$0xff] }
  0x20   : > { %467 = vst.msk [vmem:[#allocation2 + $0x138] sm:$0x1] %vm453_vm0, %v2437_v1  ;;  %v1185_v40 = vmul.f32 %v2615_v35, %v653_v36  ;;  %v2668_v52 = vld [vmem:[#allocation2 + $0x80] sm:$0xff]  ;;  %v791_v55 = vmul.f32 %v2540_v10, %v653_v36  ;;  %v688_v3 = vmul.f32 %v2528_v8, %v2683_v60  ;;  %v856_v4 = vmul.f32 %v2545_v11, %v581_v28 }
  0x21   : > { %v886_v29 = vadd.f32 %v854_v22, %v819_v25  ;;  %468 = vst.msk [vmem:[#allocation2 + $0x150] sm:$0x1] %vm453_vm0, %v2437_v1  ;;  %v756_v53 = vadd.f32 %v724_v48, %v690_v47  ;;  %v757_v58 = vadd.f32 %v725_v50, %v691_v49  ;;  %v857_v0 = vmul.f32 %v2545_v11, %v2668_v52  ;;  %v2702_v5 = vld [vmem:[#allocation2 + $0x81] sm:$0xff]  ;;  %v516_v47 = vld [vmem:[%s2511_s8 + $0x50] sm:$0xff]  ;;  %v517_v50 = vld [vmem:[%s2511_s8 + $0x58] sm:$0xff] }
  0x22   : > { %469 = vst.msk [vmem:[#allocation2 + $0x168] sm:$0x1] %vm453_vm0, %v2437_v1  ;;  %v922_v15 = vmul.f32 %v2564_v17, %v617_v32  ;;  %v2708_v16 = vmul.f32 %v2581_v23, %v653_v36  ;;  %v755_v21 = vadd.f32 %v723_v54, %v689_v62  ;;  %v754_v22 = vadd.f32 %v722_v61, %v688_v3  ;;  %v506_v32 = vld [vmem:[%s2511_s8] sm:$0xff] }
  0x23   : > { %v952_v33 = vadd.f32 %v920_v26, %v886_v29  ;;  %470 = vst.msk [vmem:[#allocation2 + $0x180] sm:$0x1] %vm453_vm0, %v2437_v1  ;;  %v2713_v25 = vadd.f32 %v791_v55, %v757_v58  ;;  %v509_v26 = vld [vmem:[%s2511_s8 + $0x18] sm:$0xff]  ;;  %v2720_v28 = vmul.f32 %v2545_v11, %v2549_v12  ;;  %v2724_v29 = vmul.f32 %v2564_v17, %v2551_v13  ;;  %v490_v49 = vld [vmem:[%s403_s13] sm:$0xff]  ;;  %v491_v55 = vld [vmem:[%s403_s13 + $0x8] sm:$0xff] }
  0x24   : > { %471 = vst.msk [vmem:[#allocation2 + $0x198] sm:$0x1] %vm453_vm0, %v2437_v1  ;;  %v821_v36 = vadd.f32 %v789_v63, %v755_v21  ;;  %v692_v54 = vmul.f32 %v2528_v8, %v2668_v52  ;;  %v2782_v58 = vmul.f32 %v2615_v35, %v2555_v14  ;;  %v2788_v61 = vmul.f32 %v2564_v17, %v2677_v57  ;;  %v518_v62 = vld [vmem:[%s2511_s8 + $0x60] sm:$0xff]  ;;  %v519_v63 = vld [vmem:[%s2511_s8 + $0x68] sm:$0xff] }
  0x25   : > { %v1018_v37 = vadd.f32 %v986_v30, %v952_v33  ;;  %472 = vst.msk [vmem:[#allocation2 + $0x11] sm:$0x1] %vm453_vm0, %v2437_v1  ;;  %v855_v30 = vmul.f32 %v2545_v11, %v2640_v43  ;;  %v494_v21 = vmul.f32 0.0, %v491_v55 }
  0x26   : > { %473 = vst.msk [vmem:[#allocation2 + $0x29] sm:$0x1] %vm453_vm0, %v2437_v1 }
  0x27   : > { %v1085_v39 = vadd.f32 %v1053_v34, %v1018_v37  ;;  %474 = vst.msk [vmem:[#allocation2 + $0x41] sm:$0x1] %vm453_vm0, %v2437_v1  ;;  %v923_v34 = vmul.f32 %v2564_v17, %v2702_v5 }
  0x28   : > { %475 = vst.msk [vmem:[#allocation2 + $0x59] sm:$0x1] %vm453_vm0, %v2437_v1 }
  0x29   : > { %v1151_v41 = vadd.f32 %v1119_v38, %v1085_v39  ;;  %476 = vst.msk [vmem:[#allocation2 + $0x71] sm:$0x1] %vm453_vm0, %v2437_v1  ;;  %v2740_v38 = vmul.f32 %v2581_v23, %v2555_v14  ;;  %v2744_v39 = vmul.f32 %v2594_v27, %v2568_v18  ;;  %v888_v18 = vadd.f32 %v856_v4, %v821_v36 }
  0x2a   : > { %477 = vst.msk [vmem:[#allocation2 + $0x89] sm:$0x1] %vm453_vm0, %v2437_v1  ;;  %v493_v14 = vmul.f32 0.0, %v490_v49 }
  0x2b   : > { %v1217_v45 = vadd.f32 %v1185_v40, %v1151_v41  ;;  %478 = vst.msk [vmem:[#allocation2 + $0xa1] sm:$0x1] %vm453_vm0, %v2437_v1  ;;  %v507_v40 = vld [vmem:[%s2511_s8 + $0x8] sm:$0xff]  ;;  %v2753_v41 = vmul.f32 %v2594_v27, %v2549_v12  ;;  %v2768_v12 = vmul.f32 %v2605_v31, %v2551_v13 }
  0x2c   : > { %479 = vst.msk [vmem:[#allocation2 + $0xb9] sm:$0x1] %vm453_vm0, %v2437_v1 }
  0x2d   : > { %v1253_v46 = vadd.f32 %v2634_v42, %v1217_v45  ;;  %480 = vst.msk [vmem:[#allocation2 + $0xd1] sm:$0x1] %vm453_vm0, %v2437_v1 }
  0x2e   : > { %481 = vst.msk [vmem:[#allocation2 + $0xe9] sm:$0x1] %vm453_vm0, %v2437_v1 }
  0x2f   : > { %v2659_v51 = vmax.f32 %v1253_v46, 0.0  ;;  %482 = vst.msk [vmem:[#allocation2 + $0x101] sm:$0x1] %vm453_vm0, %v2437_v1  ;;  %v2695_v2 = vld [vmem:[#allocation2 + $0x52] sm:$0xff]  ;;  %v2760_v46 = vmul.f32 %v2615_v35, %v2585_v24  ;;  %v726_v24 = vmul.f32 %v2534_v9, %v2702_v5 }
  0x30   : > { %483 = vst.msk [vmem:[#allocation2 + $0x119] sm:$0x1] %vm453_vm0, %v2437_v1  ;;  %v2675_v56 = vld [vmem:[#allocation2 + $0x6a] sm:$0xff]  ;;  %v788_v7 = vmul.f32 %v2540_v10, %v2695_v2 }
  0x31   : > { %4339 = vst [vmem:[#allocation3_spill] sm:$0xff] %v2659_v51  ;;  %1344 = vperm.xlu0 %2381, %v2659_v51   ;;  %v790_v59 = vmul.f32 %v2540_v10, %v2675_v56  ;;  %v2755_v45 = vld [vmem:[#allocation2 + $0x82] sm:$0xff]  ;;  %v987_v4 = vmul.f32 %v2581_v23, %v2675_v56  ;;  %v2827_v36 = vmul.f32 %v2615_v35, %v2675_v56 }
  0x32   : > { %484 = vst.msk [vmem:[#allocation2 + $0x131] sm:$0x1] %vm453_vm0, %v2437_v1  ;;  %v820_v37 = vadd.f32 %v788_v7, %v754_v22  ;;  %v2802_v7 = vmul.f32 %v2594_v27, %v2640_v43  ;;  %v792_v22 = vmul.f32 %v2540_v10, %v2755_v45  ;;  %v758_v43 = vadd.f32 %v726_v24, %v692_v54 }
  0x33   : > { %485 = vst.msk [vmem:[#allocation2 + $0x149] sm:$0x1] %vm453_vm0, %v2437_v1  ;;  %v822_v6 = vadd.f32 %v790_v59, %v756_v53  ;;  %v2775_v53 = vmul.f32 %v2545_v11, %v2683_v60  ;;  %v989_v59 = vmul.f32 %v2581_v23, %v2755_v45 }
  0x34   : > { %486 = vst.msk [vmem:[#allocation2 + $0x161] sm:$0x1] %vm453_vm0, %v2437_v1  ;;  %v887_v48 = vadd.f32 %v855_v30, %v820_v37  ;;  %v2817_v30 = vmul.f32 %v2605_v31, %v2677_v57  ;;  %v1054_v57 = vmul.f32 %v2594_v27, %v2668_v52 }
  0x35   : > { %487 = vst.msk [vmem:[#allocation2 + $0x179] sm:$0x1] %vm453_vm0, %v2437_v1  ;;  %v889_v33 = vadd.f32 %v857_v0, %v822_v6  ;;  %v954_v0 = vadd.f32 %v922_v15, %v888_v18  ;;  %v2798_v6 = vmul.f32 %v2581_v23, %v2695_v2  ;;  %v520_v15 = vld [vmem:[%s2511_s8 + $0x70] sm:$0xff] }
  0x36   : > { %4340 = vst [vmem:[#allocation4_spill] sm:$0xff] %v2713_v25 }
  0x37   : > { %488 = vst.msk [vmem:[#allocation2 + $0x191] sm:$0x1] %vm453_vm0, %v2437_v1  ;;  %v955_v13 = vadd.f32 %v923_v34, %v889_v33 }
  0x38   : > { %489 = vst.msk [vmem:[#allocation2 + $0x1a9] sm:$0x1] %vm453_vm0, %v2437_v1  ;;  %v2748_v1 = vmul.f32 %v2605_v31, %v2570_v19  ;;  %v921_v19 = vmul.f32 %v2564_v17, %v2642_v44 }
  0x39   : > { %541 = vst.msk [vmem:[#allocation2 + $0x31] sm:$0xff] %vm495_vm1, %v508_v20  ;;  %v2806_v20 = vmul.f32 %v2594_v27, %v2683_v60  ;;  %v1021_v34 = vadd.f32 %v989_v59, %v955_v13 }
  0x3a   : > { %542 = vst.msk [vmem:[#allocation2 + $0x39] sm:$0xff] %vm495_vm1, %v509_v26  ;;  %v953_v3 = vadd.f32 %v921_v19, %v887_v48  ;;  %v2813_v26 = vmul.f32 %v2605_v31, %v2642_v44  ;;  %v2831_v44 = vmul.f32 %v2615_v35, %v2695_v2  ;;  %v2848_v2 = vadd.f32 %v2708_v16, %v954_v0 }
  0x3b   : > { %539 = vst.msk [vmem:[#allocation2 + $0x19] sm:$0xff] %vm495_vm1, %v506_v32  ;;  %v521_v32 = vld [vmem:[%s2511_s8 + $0x78] sm:$0xff]  ;;  %v2865_v16 = vmul.f32 %v2605_v31, %v2702_v5 }
  0x3c   : > { %540 = vst.msk [vmem:[#allocation2 + $0x21] sm:$0xff] %vm495_vm1, %v507_v40  ;;  %v1019_v48 = vadd.f32 %v987_v4, %v953_v3  ;;  %v2877_v3 = vadd.f32 %v792_v22, %v758_v43 }
  0x3d   : > { %549 = vst.msk [vmem:[#allocation2 + $0x91] sm:$0xff] %vm495_vm1, %v516_v47 }
  0x3e   : > { %550 = vst.msk [vmem:[#allocation2 + $0x99] sm:$0xff] %vm495_vm1, %v517_v50 }
  0x3f   : > { %551 = vst.msk [vmem:[#allocation2 + $0xa9] sm:$0xff] %vm495_vm1, %v518_v62 }
  0x40   : > { %v2821_v33 = vld [vmem:[#allocation2 + $0x30] sm:$0xff]  ;;  %552 = vst.msk [vmem:[#allocation2 + $0xb1] sm:$0xff] %vm495_vm1, %v519_v63 }
  0x41   : > { %4341 = vst [vmem:[#allocation5_spill] sm:$0xff] %v2821_v33  ;;  %v2823_v60 = vld [vmem:[#allocation2 + $0x31] sm:$0xff]  ;;  %v685_v40 = vmul.f32 %v2528_v8, %v2821_v33  ;;  %v2844_v56 = vld [vmem:[#allocation2 + $0x39] sm:$0xff]  ;;  %v850_v4 = vmul.f32 %v2545_v11, %v2821_v33 }
  0x42   : > { %4342 = vst [vmem:[#allocation6_spill] sm:$0xff] %v2823_v60  ;;  %v2836_v37 = vld [vmem:[#allocation2 + $0x32] sm:$0xff]  ;;  %v719_v47 = vmul.f32 %v2534_v9, %v2823_v60  ;;  %v2856_v50 = vld [vmem:[#allocation2 + $0x3a] sm:$0xff]  ;;  %v720_v54 = vmul.f32 %v2534_v9, %v2844_v56  ;;  %v917_v25 = vmul.f32 %v2564_v17, %v2844_v56 }
  0x43   : > { %4343 = vst [vmem:[#allocation7_spill] sm:$0xff] %v2836_v37  ;;  %v2842_v18 = vld [vmem:[#allocation2 + $0x38] sm:$0xff]  ;;  %v785_v52 = vmul.f32 %v2540_v10, %v2836_v37  ;;  %v2873_v63 = vld [vmem:[#allocation2 + $0x20] sm:$0xff] }
  0x44   : > { %4344 = vst [vmem:[#allocation8_spill] sm:$0xff] %v2842_v18  ;;  %v2852_v19 = vld [vmem:[#allocation2 + $0x18] sm:$0xff]  ;;  %v686_v24 = vmul.f32 %v2528_v8, %v2842_v18  ;;  %v751_v55 = vadd.f32 %v719_v47, %v685_v40  ;;  %v2875_v0 = vld [vmem:[#allocation2 + $0x21] sm:$0xff] }
  0x45   : > { %553 = vst.msk [vmem:[#allocation2 + $0xc1] sm:$0xff] %vm495_vm1, %v520_v15  ;;  %v2854_v49 = vld [vmem:[#allocation2 + $0x19] sm:$0xff]  ;;  %v683_v59 = vmul.f32 %v2528_v8, %v2852_v19  ;;  %v2886_v40 = vld [vmem:[#allocation2 + $0x22] sm:$0xff] }
  0x46   : > { %4345 = vst [vmem:[#allocation9_spill] sm:$0xff] %v2852_v19  ;;  %v2867_v13 = vld [vmem:[#allocation2 + $0x1a] sm:$0xff]  ;;  %v717_v62 = vmul.f32 %v2534_v9, %v2854_v49  ;;  %v752_v15 = vadd.f32 %v720_v54, %v686_v24  ;;  %v817_v47 = vadd.f32 %v785_v52, %v751_v55  ;;  %v916_v24 = vmul.f32 %v2564_v17, %v2823_v60 }
  0x47   : > { %4346 = vst [vmem:[#allocation10_spill] sm:$0xff] %v2854_v49  ;;  %v783_v5 = vmul.f32 %v2540_v10, %v2867_v13  ;;  %v584_v22 = vld [vmem:[#allocation2 + $0x98] sm:$0xff]  ;;  %v982_v54 = vmul.f32 %v2581_v23, %v2836_v37  ;;  %v784_v33 = vmul.f32 %v2540_v10, %v2886_v40 }
  0x48   : > { %554 = vst.msk [vmem:[#allocation2 + $0xc9] sm:$0xff] %vm495_vm1, %v521_v32  ;;  %v786_v32 = vmul.f32 %v2540_v10, %v2856_v50  ;;  %v749_v51 = vadd.f32 %v717_v62, %v683_v59  ;;  %v620_v43 = vld [vmem:[#allocation2 + $0x99] sm:$0xff]  ;;  %v884_v52 = vadd.f32 %v2720_v28, %v817_v47  ;;  %v694_v62 = vmul.f32 %v2528_v8, %v584_v22  ;;  %v2910_v28 = vld [vmem:[#allocation2 + $0x90] sm:$0xff] }
  0x49   : > { %4347 = vst [vmem:[#allocation11_spill] sm:$0xff] %v2867_v13  ;;  %v718_v13 = vmul.f32 %v2534_v9, %v2875_v0  ;;  %v656_v59 = vld [vmem:[#allocation2 + $0x9a] sm:$0xff]  ;;  %v1056_v37 = vmul.f32 %v2594_v27, %v584_v22  ;;  %v1122_v49 = vmul.f32 %v2605_v31, %v620_v43  ;;  %v2915_v47 = vmul.f32 %v2545_v11, %v584_v22 }
  0x4a   : > { %4348 = vst [vmem:[#allocation12_spill] sm:$0xff] %v2873_v63  ;;  %v815_v55 = vadd.f32 %v783_v5, %v749_v51  ;;  %v794_v60 = vmul.f32 %v2540_v10, %v656_v59  ;;  %v2912_v5 = vld [vmem:[#allocation2 + $0x91] sm:$0xff]  ;;  %v1188_v19 = vmul.f32 %v2615_v35, %v656_v59  ;;  %v693_v22 = vmul.f32 %v2528_v8, %v2910_v28 }
  0x4b   : > { %4349 = vst [vmem:[#allocation13_spill] sm:$0xff] %v2875_v0  ;;  %v851_v0 = vmul.f32 %v2545_v11, %v2842_v18  ;;  %v1088_v18 = vadd.f32 %v1056_v37, %v1021_v34  ;;  %v727_v34 = vmul.f32 %v2534_v9, %v2912_v5  ;;  %v522_v37 = vld [vmem:[%s2511_s8 + $0x80] sm:$0xff] }
  0x4c   : > { %4350 = vst [vmem:[#allocation14_spill] sm:$0xff] %v2877_v3 }
  0x4d   : > { %496 = vst.msk [vmem:[#allocation2 + $0x1] sm:$0xff] %vm495_vm1, %v493_v14  ;;  %v684_v14 = vmul.f32 %v2528_v8, %v2873_v63  ;;  %v728_v63 = vmul.f32 %v2534_v9, %v620_v43 }
  0x4e   : > { %4351 = vst [vmem:[#allocation15_spill] sm:$0xff] %v2886_v40  ;;  %v818_v40 = vadd.f32 %v786_v32, %v752_v15  ;;  %v983_v32 = vmul.f32 %v2581_v23, %v2856_v50 }
  0x4f   : > { %497 = vst.msk [vmem:[#allocation2 + $0x9] sm:$0xff] %vm495_vm1, %v494_v21  ;;  %v2899_v21 = vadd.f32 %v1054_v57, %v1019_v48  ;;  %v950_v57 = vadd.f32 %v2724_v29, %v884_v52  ;;  %v882_v48 = vadd.f32 %v850_v4, %v815_v55  ;;  %v750_v51 = vadd.f32 %v718_v13, %v684_v14  ;;  %v523_v55 = vld [vmem:[%s2511_s8 + $0x88] sm:$0xff] }
  0x50   : > { %v885_v4 = vadd.f32 %v2775_v53, %v818_v40  ;;  %v1154_v13 = vadd.f32 %v1122_v49, %v1088_v18  ;;  %v2931_v53 = vld [vmem:[#allocation2 + $0x92] sm:$0xff]  ;;  %555 = vst.msk [vmem:[#allocation2 + $0xd9] sm:$0xff] %vm495_vm1, %v522_v37  ;;  %v2938_v18 = vmul.f32 %v2581_v23, %v656_v59  ;;  %v759_v40 = vadd.f32 %v727_v34, %v693_v22 }
  0x51   : > { %v1016_v3 = vadd.f32 %v2740_v38, %v950_v57  ;;  %v948_v29 = vadd.f32 %v916_v24, %v882_v48  ;;  %v816_v15 = vadd.f32 %v784_v33, %v750_v51  ;;  %v2935_v33 = vmul.f32 %v2564_v17, %v620_v43  ;;  %556 = vst.msk [vmem:[#allocation2 + $0xe1] sm:$0xff] %vm495_vm1, %v523_v55  ;;  %v2954_v51 = vld [vmem:[#allocation2 + $0xa9] sm:$0xff] }
  0x52   : > { %v951_v38 = vadd.f32 %v2788_v61, %v885_v4  ;;  %v1220_v49 = vadd.f32 %v1188_v19, %v1154_v13  ;;  %v760_v43 = vadd.f32 %v728_v63, %v694_v62  ;;  %v793_v19 = vmul.f32 %v2540_v10, %v2931_v53 }
  0x53   : > { %v1083_v14 = vadd.f32 %v2744_v39, %v1016_v3  ;;  %v1014_v52 = vadd.f32 %v982_v54, %v948_v29  ;;  %v883_v24 = vadd.f32 %v851_v0, %v816_v15  ;;  %v2944_v3 = vld [vmem:[#allocation2 + $0xa8] sm:$0xff]  ;;  %v587_v54 = vld [vmem:[#allocation2 + $0xc0] sm:$0xff]  ;;  %v2972_v34 = vmul.f32 %v2534_v9, %v2954_v51 }
  0x54   : > { %v1017_v61 = vadd.f32 %v2798_v6, %v951_v38  ;;  %v1256_v48 = vadd.f32 %v2634_v42, %v1220_v49  ;;  %v697_v59 = vmul.f32 %v2528_v8, %v587_v54  ;;  %v623_v29 = vld [vmem:[#allocation2 + $0xc1] sm:$0xff]  ;;  %v825_v62 = vadd.f32 %v793_v19, %v759_v40 }
  0x55   : > { %v1149_v57 = vadd.f32 %v2748_v1, %v1083_v14  ;;  %v1081_v39 = vadd.f32 %v2753_v41, %v1014_v52  ;;  %v949_v0 = vadd.f32 %v917_v25, %v883_v24  ;;  %v731_v63 = vmul.f32 %v2534_v9, %v623_v29 }
  0x56   : > { %v1084_v6 = vadd.f32 %v2802_v7, %v1017_v61  ;;  %v2956_v4 = vmax.f32 %v1256_v48, 0.0  ;;  %v860_v15 = vmul.f32 %v2545_v11, %v2944_v3  ;;  %v2967_v22 = vadd.f32 %v794_v60, %v760_v43  ;;  %v659_v60 = vld [vmem:[#allocation2 + $0xc2] sm:$0xff] }
  0x57   : > { %v1215_v1 = vadd.f32 %v2760_v46, %v1149_v57  ;;  %v1147_v41 = vadd.f32 %v2768_v12, %v1081_v39  ;;  %v1015_v25 = vadd.f32 %v983_v32, %v949_v0  ;;  %v2965_v32 = vld [vmem:[#allocation2 + $0xaa] sm:$0xff]  ;;  %v926_v14 = vmul.f32 %v2564_v17, %v2954_v51 }
  0x58   : > { %v1150_v12 = vadd.f32 %v2813_v26, %v1084_v6  ;;  %1359 = vperm.xlu0 %2381, %v2956_v4   ;;  %v892_v37 = vadd.f32 %v860_v15, %v825_v62  ;;  %v763_v38 = vadd.f32 %v731_v63, %v697_v59  ;;  %v797_v24 = vmul.f32 %v2540_v10, %v659_v60  ;;  %v586_v62 = vld [vmem:[#allocation2 + $0xb0] sm:$0xff] }
  0x59   : > { %v1251_v13 = vadd.f32 %v2634_v42, %v1215_v1  ;;  %v1213_v46 = vadd.f32 %v2782_v58, %v1147_v41  ;;  %v1082_v7 = vadd.f32 %v2806_v20, %v1015_v25  ;;  %v992_v40 = vmul.f32 %v2581_v23, %v2965_v32  ;;  %v524_v1 = vld [vmem:[%s2511_s8 + $0x90] sm:$0xff] }
  0x5a   : > { %v1216_v20 = vadd.f32 %v2827_v36, %v1150_v12  ;;  %v958_v49 = vadd.f32 %v926_v14, %v892_v37  ;;  %v1059_v36 = vmul.f32 %v2594_v27, %v587_v54  ;;  %v1125_v0 = vmul.f32 %v2605_v31, %v623_v29  ;;  %v622_v15 = vld [vmem:[#allocation2 + $0xb1] sm:$0xff]  ;;  %557 = vst.msk [vmem:[#allocation2 + $0xf1] sm:$0xff] %vm495_vm1, %v524_v1 }
  0x5b   : > { %v2976_v52 = vmax.f32 %v1251_v13, 0.0  ;;  %v1249_v58 = vadd.f32 %v2634_v42, %v1213_v46  ;;  %v1148_v26 = vadd.f32 %v2817_v30, %v1082_v7  ;;  %v2992_v30 = vmul.f32 %v2540_v10, %v2965_v32 }
  0x5c   : > { %v1252_v57 = vadd.f32 %v2634_v42, %v1216_v20  ;;  %v1024_v61 = vadd.f32 %v992_v40, %v958_v49  ;;  %v1055_v43 = vmul.f32 %v2594_v27, %v2910_v28  ;;  %v1191_v59 = vmul.f32 %v2615_v35, %v659_v60 }
  0x5d   : > { %1334 = vperm.xlu2 %2380, %v2976_v52   ;;  %v2985_v55 = vmax.f32 %v1249_v58, 0.0  ;;  %v1214_v39 = vadd.f32 %v2831_v44, %v1148_v26  ;;  %v1121_v44 = vmul.f32 %v2605_v31, %v2912_v5  ;;  %v1187_v19 = vmul.f32 %v2615_v35, %v2931_v53  ;;  %v658_v26 = vld [vmem:[#allocation2 + $0xb2] sm:$0xff] }
  0x5e   : > { %v1091_v41 = vadd.f32 %v1059_v36, %v1024_v61  ;;  %v1087_v6 = vadd.f32 %v1055_v43, %v2848_v2  ;;  %v1152_v25 = vadd.f32 %v2865_v16, %v2899_v21  ;;  %v1186_v63 = vmul.f32 %v2615_v35, %v2755_v45  ;;  %v525_v2 = vld [vmem:[%s2511_s8 + $0x98] sm:$0xff] }
  0x5f   : > { %1324 = vperm.xlu1 %2379, %v2985_v55   ;;  %v1250_v48 = vadd.f32 %v2634_v42, %v1214_v39  ;;  %v3011_v13 = vmax.f32 %v1252_v57, 0.0  ;;  %v3013_v46 = vadd.f32 %v797_v24, %v763_v38  ;;  %v696_v12 = vmul.f32 %v2528_v8, %v586_v62  ;;  %558 = vst.msk [vmem:[#allocation2 + $0xf9] sm:$0xff] %vm495_vm1, %v525_v2  ;;  %v4352_v38 = vld [vmem:[#allocation14_spill] sm:$0xff]  ;;  %v526_v57 = vld [vmem:[%s2511_s8 + $0xa0] sm:$0xff] }
  0x60   : > { %v730_v7 = vmul.f32 %v2534_v9, %v622_v15  ;;  %v3019_v37 = vmul.f32 %v2545_v11, %v587_v54  ;;  %v3022_v16 = vmul.f32 %v2564_v17, %v623_v29  ;;  %v1157_v45 = vadd.f32 %v1125_v0, %v1091_v41  ;;  %559 = vst.msk [vmem:[#allocation2 + $0x109] sm:$0xff] %vm495_vm1, %v526_v57 }
  0x61   : > { %v1153_v21 = vadd.f32 %v1121_v44, %v1087_v6  ;;  %v3025_v14 = vmax.f32 %v1250_v48, 0.0  ;;  %v3028_v58 = vmul.f32 %v2581_v23, %v659_v60  ;;  %v1218_v20 = vadd.f32 %v1186_v63, %v1152_v25  ;;  %v607_v44 = vld [vmem:[#allocation2 + $0x1] sm:$0xff]  ;;  %v4354_v63 = vld [vmem:[#allocation4_spill] sm:$0xff] }
  0x62   : > { %v891_v24 = vadd.f32 %v2915_v47, %v4352_v38  ;;  %v1223_v49 = vadd.f32 %v1191_v59, %v1157_v45  ;;  %v796_v40 = vmul.f32 %v2540_v10, %v658_v26  ;;  %v3034_v29 = vmul.f32 %v2545_v11, %v586_v62  ;;  %v571_v59 = vld [vmem:[#allocation2] sm:$0xff] }
  0x63   : > { %v1219_v54 = vadd.f32 %v1187_v19, %v1153_v21  ;;  %v762_v39 = vadd.f32 %v730_v7, %v696_v12  ;;  %v3039_v36 = vmul.f32 %v2564_v17, %v622_v15  ;;  %v1058_v61 = vmul.f32 %v2594_v27, %v586_v62  ;;  %v643_v6 = vld [vmem:[#allocation2 + $0x2] sm:$0xff] }
  0x64   : > { %v957_v60 = vadd.f32 %v2935_v33, %v891_v24  ;;  %v1259_v47 = vadd.f32 %v2634_v42, %v1223_v49  ;;  %v3046_v43 = vmul.f32 %v2581_v23, %v658_v26  ;;  %v858_v48 = vmul.f32 %v2545_v11, %v2910_v28  ;;  %v527_v7 = vld [vmem:[%s2511_s8 + $0xa8] sm:$0xff] }
  0x65   : > { %1339 = vperm.xlu2 %2380, %v3011_v13   ;;  %v1255_v0 = vadd.f32 %v2634_v42, %v1219_v54  ;;  %v1254_v33 = vadd.f32 %v2634_v42, %v1218_v20  ;;  %v1124_v1 = vmul.f32 %v2605_v31, %v622_v15  ;;  %v924_v41 = vmul.f32 %v2564_v17, %v2912_v5  ;;  %v4357_v54 = vld [vmem:[#allocation9_spill] sm:$0xff] }
  0x66   : > { %v1023_v19 = vadd.f32 %v2938_v18, %v957_v60  ;;  %v3057_v25 = vmax.f32 %v1259_v47, 0.0  ;;  %v1190_v28 = vmul.f32 %v2615_v35, %v658_v26  ;;  %v890_v62 = vadd.f32 %v858_v48, %v4354_v63  ;;  %560 = vst.msk [vmem:[#allocation2 + $0x111] sm:$0xff] %vm495_vm1, %v527_v7  ;;  %v528_v26 = vld [vmem:[%s2511_s8 + $0xb0] sm:$0xff]  ;;  %v589_v47 = vld [vmem:[#allocation2 + $0xd8] sm:$0xff] }
  0x67   : > { %1329 = vperm.xlu1 %2379, %v3025_v14   ;;  %v990_v12 = vmul.f32 %v2581_v23, %v2931_v53  ;;  %v3064_v2 = vmax.f32 %v1255_v0, 0.0  ;;  %v681_v15 = vmul.f32 %v2528_v8, %v571_v59  ;;  %v715_v45 = vmul.f32 %v2534_v9, %v607_v44  ;;  %561 = vst.msk [vmem:[#allocation2 + $0x121] sm:$0xff] %vm495_vm1, %v528_v26  ;;  %v625_v0 = vld [vmem:[#allocation2 + $0xd9] sm:$0xff]  ;;  %v624_v26 = vld [vmem:[#allocation2 + $0xc9] sm:$0xff] }
  0x68   : > { %4353 = vst [vmem:[#allocation14_spill] sm:$0xff] %v3057_v25  ;;  %v1090_v18 = vadd.f32 %v1058_v61, %v1023_v19  ;;  %1374 = vperm.xlu0 %2381, %v3057_v25   ;;  %v3070_v5 = vadd.f32 %v796_v40, %v762_v39  ;;  %v956_v21 = vadd.f32 %v924_v41, %v890_v62  ;;  %v3076_v38 = vmax.f32 %v1254_v33, 0.0  ;;  %v4358_v39 = vld [vmem:[#allocation10_spill] sm:$0xff]  ;;  %v529_v59 = vld [vmem:[%s2511_s8 + $0xb8] sm:$0xff] }
  0x69   : > { %4355 = vst [vmem:[#allocation4_spill] sm:$0xff] %v3064_v2  ;;  %v1057_v20 = vmul.f32 %v2594_v27, %v2944_v3  ;;  %v781_v53 = vmul.f32 %v2540_v10, %v643_v6  ;;  %v747_v49 = vadd.f32 %v715_v45, %v681_v15  ;;  %v848_v57 = vmul.f32 %v2545_v11, %v4357_v54  ;;  %v4359_v6 = vld [vmem:[#allocation11_spill] sm:$0xff]  ;;  %v661_v45 = vld [vmem:[#allocation2 + $0xda] sm:$0xff] }
  0x6a   : > { %4356 = vst [vmem:[#allocation16_spill] sm:$0xff] %v3076_v38  ;;  %v1156_v24 = vadd.f32 %v1124_v1, %v1090_v18  ;;  %v1022_v60 = vadd.f32 %v990_v12, %v956_v21  ;;  %v1123_v40 = vmul.f32 %v2605_v31, %v2954_v51  ;;  %v914_v61 = vmul.f32 %v2564_v17, %v4358_v39  ;;  %v4360_v12 = vld [vmem:[#allocation5_spill] sm:$0xff]  ;;  %v4361_v18 = vld [vmem:[#allocation6_spill] sm:$0xff]  ;;  %v4363_v54 = vld [vmem:[#allocation7_spill] sm:$0xff] }
  0x6b   : > { %v695_v48 = vmul.f32 %v2528_v8, %v2944_v3  ;;  %v813_v33 = vadd.f32 %v781_v53, %v747_v49  ;;  %v699_v19 = vmul.f32 %v2528_v8, %v589_v47  ;;  %v733_v1 = vmul.f32 %v2534_v9, %v625_v0  ;;  %562 = vst.msk [vmem:[#allocation2 + $0x129] sm:$0xff] %vm495_vm1, %v529_v59  ;;  %v588_v53 = vld [vmem:[#allocation2 + $0xc8] sm:$0xff] }
  0x6c   : > { %v1222_v44 = vadd.f32 %v1190_v28, %v1156_v24  ;;  %v1089_v41 = vadd.f32 %v1057_v20, %v1022_v60  ;;  %v1189_v51 = vmul.f32 %v2615_v35, %v2965_v32  ;;  %v980_v63 = vmul.f32 %v2581_v23, %v4359_v6  ;;  %v572_v6 = vld [vmem:[#allocation2 + $0x8] sm:$0xff] }
  0x6d   : > { %1354 = vperm.xlu2 %2380, %v3064_v2   ;;  %v761_v62 = vadd.f32 %v2972_v34, %v695_v48  ;;  %v880_v28 = vadd.f32 %v848_v57, %v813_v33  ;;  %v1047_v7 = vmul.f32 %v2594_v27, %v4360_v12  ;;  %v1113_v15 = vmul.f32 %v2605_v31, %v4361_v18  ;;  %v644_v12 = vld [vmem:[#allocation2 + $0xa] sm:$0xff] }
  0x6e   : > { %v1258_v3 = vadd.f32 %v2634_v42, %v1222_v44  ;;  %v1155_v32 = vadd.f32 %v1123_v40, %v1089_v41  ;;  %v765_v21 = vadd.f32 %v733_v1, %v699_v19  ;;  %v799_v20 = vmul.f32 %v2540_v10, %v661_v45 }
  0x6f   : > { %1349 = vperm.xlu1 %2379, %v3076_v38   ;;  %v827_v34 = vadd.f32 %v2992_v30, %v761_v62  ;;  %v946_v49 = vadd.f32 %v914_v61, %v880_v28  ;;  %v1179_v57 = vmul.f32 %v2615_v35, %v4363_v54  ;;  %v3110_v60 = vmul.f32 %v2545_v11, %v589_v47  ;;  %v660_v30 = vld [vmem:[#allocation2 + $0xca] sm:$0xff] }
  0x70   : > { %v3105_v24 = vmax.f32 %v1258_v3, 0.0  ;;  %v1221_v39 = vadd.f32 %v1189_v51, %v1155_v32  ;;  %v3114_v40 = vmul.f32 %v2564_v17, %v625_v0  ;;  %v3117_v59 = vmul.f32 %v2581_v23, %v661_v45  ;;  %v608_v28 = vld [vmem:[#allocation2 + $0x9] sm:$0xff] }
  0x71   : > { %v894_v48 = vadd.f32 %v3019_v37, %v827_v34  ;;  %v1012_v44 = vadd.f32 %v980_v63, %v946_v49  ;;  %v1061_v33 = vmul.f32 %v2594_v27, %v589_v47  ;;  %v698_v61 = vmul.f32 %v2528_v8, %v588_v53  ;;  %v530_v49 = vld [vmem:[%s2511_s8 + $0xc0] sm:$0xff] }
  0x72   : > { %4362 = vst [vmem:[#allocation9_spill] sm:$0xff] %v3105_v24  ;;  %v732_v19 = vmul.f32 %v2534_v9, %v624_v26  ;;  %v1257_v1 = vadd.f32 %v2634_v42, %v1221_v39  ;;  %v3123_v41 = vadd.f32 %v799_v20, %v765_v21  ;;  %v893_v51 = vadd.f32 %v3034_v29, %v2967_v22 }
  0x73   : > { %v960_v37 = vadd.f32 %v3022_v16, %v894_v48  ;;  %v1079_v62 = vadd.f32 %v1047_v7, %v1012_v44  ;;  %v1127_v63 = vmul.f32 %v2605_v31, %v625_v0  ;;  %v1193_v47 = vmul.f32 %v2615_v35, %v661_v45  ;;  %563 = vst.msk [vmem:[#allocation2 + $0x139] sm:$0xff] %vm495_vm1, %v530_v49 }
  0x74   : > { %v798_v3 = vmul.f32 %v2540_v10, %v660_v30  ;;  %v3132_v18 = vmax.f32 %v1257_v1, 0.0  ;;  %v959_v32 = vadd.f32 %v3039_v36, %v893_v51  ;;  %v1060_v22 = vmul.f32 %v2594_v27, %v588_v53  ;;  %v3161_v51 = vld [vmem:[#allocation2 + $0xe0] sm:$0xff] }
  0x75   : > { %1369 = vperm.xlu2 %2380, %v3105_v24   ;;  %v1026_v16 = vadd.f32 %v3028_v58, %v960_v37  ;;  %v1145_v29 = vadd.f32 %v1113_v15, %v1079_v62  ;;  %v764_v21 = vadd.f32 %v732_v19, %v698_v61  ;;  %v1126_v7 = vmul.f32 %v2605_v31, %v624_v26  ;;  %v531_v19 = vld [vmem:[%s2511_s8 + $0xc8] sm:$0xff]  ;;  %v4366_v37 = vld [vmem:[#allocation13_spill] sm:$0xff] }
  0x76   : > { %4364 = vst [vmem:[#allocation10_spill] sm:$0xff] %v3132_v18  ;;  %v682_v0 = vmul.f32 %v2528_v8, %v572_v6  ;;  %v1025_v20 = vadd.f32 %v3046_v43, %v959_v32  ;;  %v716_v34 = vmul.f32 %v2534_v9, %v608_v28  ;;  %v782_v58 = vmul.f32 %v2540_v10, %v644_v12  ;;  %v4365_v43 = vld [vmem:[#allocation12_spill] sm:$0xff]  ;;  %v4367_v28 = vld [vmem:[#allocation15_spill] sm:$0xff]  ;;  %v3166_v32 = vld [vmem:[#allocation2 + $0xe1] sm:$0xff] }
  0x77   : > { %1364 = vperm.xlu1 %2379, %v3132_v18   ;;  %v1093_v45 = vadd.f32 %v1061_v33, %v1026_v16  ;;  %v1211_v36 = vadd.f32 %v1179_v57, %v1145_v29  ;;  %v3145_v54 = vmul.f32 %v2545_v11, %v588_v53  ;;  %v3148_v15 = vmul.f32 %v2564_v17, %v624_v26  ;;  %v592_v16 = vld [vmem:[#allocation2 + $0xf8] sm:$0xff] }
  0x78   : > { %v1192_v39 = vmul.f32 %v2615_v35, %v660_v30  ;;  %v1092_v44 = vadd.f32 %v1060_v22, %v1025_v20  ;;  %v748_v33 = vadd.f32 %v716_v34, %v682_v0  ;;  %v849_v61 = vmul.f32 %v2545_v11, %v4365_v43  ;;  %564 = vst.msk [vmem:[#allocation2 + $0x141] sm:$0xff] %vm495_vm1, %v531_v19  ;;  %v3175_v20 = vld [vmem:[#allocation2 + $0xe2] sm:$0xff]  ;;  %v664_v43 = vld [vmem:[#allocation2 + $0xfa] sm:$0xff]  ;;  %v591_v19 = vld [vmem:[#allocation2 + $0xf0] sm:$0xff] }
  0x79   : > { %v1159_v48 = vadd.f32 %v1127_v63, %v1093_v45  ;;  %v1247_v1 = vadd.f32 %v2634_v42, %v1211_v36  ;;  %v830_v57 = vadd.f32 %v798_v3, %v764_v21  ;;  %v3157_v53 = vmul.f32 %v2581_v23, %v660_v30  ;;  %v628_v3 = vld [vmem:[#allocation2 + $0xf9] sm:$0xff] }
  0x7a   : > { %v915_v26 = vmul.f32 %v2564_v17, %v4366_v37  ;;  %v1158_v62 = vadd.f32 %v1126_v7, %v1092_v44  ;;  %v814_v63 = vadd.f32 %v782_v58, %v748_v33  ;;  %v981_v12 = vmul.f32 %v2581_v23, %v4367_v28  ;;  %v4369_v30 = vld [vmem:[#allocation8_spill] sm:$0xff] }
  0x7b   : > { %v1225_v6 = vadd.f32 %v1193_v47, %v1159_v48  ;;  %v3168_v22 = vmax.f32 %v1247_v1, 0.0  ;;  %v1048_v29 = vmul.f32 %v2594_v27, %v4369_v30  ;;  %v702_v21 = vmul.f32 %v2528_v8, %v592_v16  ;;  %v627_v1 = vld [vmem:[#allocation2 + $0xf1] sm:$0xff] }
  0x7c   : > { %v736_v0 = vmul.f32 %v2534_v9, %v628_v3  ;;  %v1224_v7 = vadd.f32 %v1192_v39, %v1158_v62  ;;  %v881_v45 = vadd.f32 %v849_v61, %v814_v63  ;;  %v865_v34 = vmul.f32 %v2545_v11, %v3161_v51  ;;  %v532_v62 = vld [vmem:[%s2511_s8 + $0xd0] sm:$0xff] }
  0x7d   : > { %4368 = vst [vmem:[#allocation11_spill] sm:$0xff] %v3168_v22  ;;  %v1261_v47 = vadd.f32 %v2634_v42, %v1225_v6  ;;  %1314 = vperm.xlu0 %2381, %v3168_v22   ;;  %v1114_v58 = vmul.f32 %v2605_v31, %v2844_v56  ;;  %v1180_v49 = vmul.f32 %v2615_v35, %v2856_v50  ;;  %v663_v30 = vld [vmem:[#allocation2 + $0xf2] sm:$0xff] }
  0x7e   : > { %v3186_v36 = vmul.f32 %v2534_v9, %v3166_v32  ;;  %v931_v39 = vmul.f32 %v2564_v17, %v3166_v32  ;;  %v1260_v44 = vadd.f32 %v2634_v42, %v1224_v7  ;;  %v947_v33 = vadd.f32 %v915_v26, %v881_v45  ;;  %565 = vst.msk [vmem:[#allocation2 + $0x151] sm:$0xff] %vm495_vm1, %v532_v62 }
  0x7f   : > { %v3190_v48 = vmax.f32 %v1261_v47, 0.0  ;;  %v897_v61 = vadd.f32 %v865_v34, %v830_v57  ;;  %v768_v56 = vadd.f32 %v736_v0, %v702_v21  ;;  %v3195_v50 = vmul.f32 %v2540_v10, %v3175_v20 }
  0x80   : > { %v802_v37 = vmul.f32 %v2540_v10, %v664_v43  ;;  %v997_v6 = vmul.f32 %v2581_v23, %v3175_v20  ;;  %v3202_v63 = vmax.f32 %v1260_v44, 0.0  ;;  %v1013_v26 = vadd.f32 %v981_v12, %v947_v33 }
  0x81   : > { %4370 = vst [vmem:[#allocation5_spill] sm:$0xff] %v3190_v48  ;;  %1384 = vperm.xlu2 %2380, %v3190_v48   ;;  %v963_v28 = vadd.f32 %v931_v39, %v897_v61  ;;  %v1064_v57 = vmul.f32 %v2594_v27, %v592_v16  ;;  %v3207_v21 = vmul.f32 %v2545_v11, %v592_v16 }
  0x82   : > { %4371 = vst [vmem:[#allocation6_spill] sm:$0xff] %v3202_v63  ;;  %v3210_v0 = vmul.f32 %v2564_v17, %v628_v3  ;;  %v701_v47 = vmul.f32 %v2528_v8, %v591_v19  ;;  %v735_v7 = vmul.f32 %v2534_v9, %v627_v1  ;;  %1379 = vperm.xlu1 %2379, %v3202_v63   ;;  %v533_v8 = vld [vmem:[%s2511_s8 + $0xd8] sm:$0xff] }
  0x83   : > { %v1080_v12 = vadd.f32 %v1048_v29, %v1013_v26  ;;  %v1029_v45 = vadd.f32 %v997_v6, %v963_v28  ;;  %v1130_v34 = vmul.f32 %v2605_v31, %v628_v3  ;;  %v896_v39 = vadd.f32 %v3110_v60, %v3013_v46  ;;  %566 = vst.msk [vmem:[#allocation2 + $0x159] sm:$0xff] %vm495_vm1, %v533_v8  ;;  %v3240_v26 = vld [vmem:[#allocation2 + $0x108] sm:$0xff] }
  0x84   : > { %v3218_v44 = vadd.f32 %v802_v37, %v768_v56  ;;  %v1196_v16 = vmul.f32 %v2615_v35, %v664_v43  ;;  %v767_v33 = vadd.f32 %v735_v7, %v701_v47  ;;  %v801_v61 = vmul.f32 %v2540_v10, %v663_v30  ;;  %v3252_v28 = vld [vmem:[#allocation2 + $0x109] sm:$0xff] }
  0x85   : > { %v1146_v62 = vadd.f32 %v1114_v58, %v1080_v12  ;;  %v1096_v9 = vadd.f32 %v1064_v57, %v1029_v45  ;;  %v962_v63 = vadd.f32 %v3114_v40, %v896_v39  ;;  %v1063_v29 = vmul.f32 %v2594_v27, %v591_v19  ;;  %v534_v58 = vld [vmem:[%s2511_s8 + $0xe0] sm:$0xff]  ;;  %v3274_v12 = vld [vmem:[#allocation2 + $0x10a] sm:$0xff] }
  0x86   : > { %v3227_v3 = vmul.f32 %v2581_v23, %v664_v43  ;;  %v3230_v46 = vmul.f32 %v2545_v11, %v591_v19  ;;  %v3233_v60 = vmul.f32 %v2564_v17, %v627_v1  ;;  %v895_v10 = vadd.f32 %v3145_v54, %v3070_v5  ;;  %567 = vst.msk [vmem:[#allocation2 + $0x169] sm:$0xff] %vm495_vm1, %v534_v58  ;;  %v535_v54 = vld [vmem:[%s2511_s8 + $0xe8] sm:$0xff]  ;;  %v3279_v45 = vld [vmem:[%s4286_s3 + $0x1] ss:$0 sm:$0xff]  ;;  %v594_v58 = vld [vmem:[#allocation2 + $0x110] sm:$0xff] }
  0x87   : > { %v1212_v56 = vadd.f32 %v1180_v49, %v1146_v62  ;;  %v1162_v40 = vadd.f32 %v1130_v34, %v1096_v9  ;;  %v1028_v37 = vadd.f32 %v3117_v59, %v962_v63  ;;  %v1129_v6 = vmul.f32 %v2605_v31, %v627_v1  ;;  %v595_v63 = vld [vmem:[#allocation2 + $0x120] sm:$0xff]  ;;  %568 = vst.msk [vmem:[#allocation2 + $0x171] sm:$0xff] %vm495_vm1, %v535_v54 }
  0x88   : > { %v833_v43 = vadd.f32 %v801_v61, %v767_v33  ;;  %v3244_v11 = vmul.f32 %v2581_v23, %v663_v30  ;;  %v961_v17 = vadd.f32 %v3148_v15, %v895_v10  ;;  %v1062_v5 = vmul.f32 %v2594_v27, %v3161_v51  ;;  %v631_v57 = vld [vmem:[#allocation2 + $0x121] sm:$0xff]  ;;  %v3261_v27 = vld [vmem:[%s4286_s3] ss:$0 sm:$0xff] }
  0x89   : > { %v1248_v49 = vadd.f32 %v2634_v42, %v1212_v56  ;;  %v1228_v19 = vadd.f32 %v1196_v16, %v1162_v40  ;;  %v1095_v59 = vadd.f32 %v1063_v29, %v1028_v37  ;;  %v1195_v1 = vmul.f32 %v2615_v35, %v663_v30  ;;  %v3267_v30 = vld [vmem:[%s4286_s3 + $0x4] ss:$0 sm:$0xff]  ;;  %v3287_v61 = vld [vmem:[%s4286_s3 + $0x5] ss:$0 sm:$0xff] }
  0x8a   : > { %v1027_v23 = vadd.f32 %v3157_v53, %v961_v17  ;;  %v1128_v15 = vmul.f32 %v2605_v31, %v3166_v32  ;;  %v705_v47 = vmul.f32 %v3261_v27, %v595_v63  ;;  %v868_v7 = vmul.f32 %v3267_v30, %v3240_v26  ;;  %v667_v29 = vld [vmem:[#allocation2 + $0x122] sm:$0xff]  ;;  %v630_v17 = vld [vmem:[#allocation2 + $0x111] sm:$0xff] }
  0x8b   : > { %v3271_v53 = vmax.f32 %v1248_v49, 0.0  ;;  %v1264_v31 = vadd.f32 %v2634_v42, %v1228_v19  ;;  %v1161_v32 = vadd.f32 %v1129_v6, %v1095_v59  ;;  %v739_v34 = vmul.f32 %v3279_v45, %v631_v57  ;;  %v3311_v6 = vld [vmem:[%s4286_s3 + $0x6] ss:$0 sm:$0xff]  ;;  %v3320_v49 = vld [vmem:[%s4286_s3 + $0x8] ss:$0 sm:$0xff] }
  0x8c   : > { %v1094_v39 = vadd.f32 %v1062_v5, %v1027_v23  ;;  %v1194_v16 = vmul.f32 %v2615_v35, %v3175_v20  ;;  %v900_v33 = vadd.f32 %v868_v7, %v833_v43  ;;  %v934_v8 = vmul.f32 %v3287_v61, %v3252_v28  ;;  %v3301_v35 = vld [vmem:[%s4286_s3 + $0x2] ss:$0 sm:$0xff]  ;;  %v3326_v59 = vld [vmem:[%s4286_s3 + $0x9] ss:$0 sm:$0xff]  ;;  %v666_v23 = vld [vmem:[#allocation2 + $0x112] sm:$0xff] }
  0x8d   : > { %1319 = vperm.xlu0 %2381, %v3271_v53   ;;  %v3292_v62 = vmax.f32 %v1264_v31, 0.0  ;;  %v1227_v9 = vadd.f32 %v1195_v1, %v1161_v32  ;;  %v3296_v10 = vmul.f32 %v3279_v45, %v3252_v28  ;;  %v3305_v20 = vmul.f32 %v3301_v35, %v3274_v12 }
  0x8e   : > { %v1160_v56 = vadd.f32 %v1128_v15, %v1094_v39  ;;  %v805_v40 = vmul.f32 %v3301_v35, %v667_v29  ;;  %v966_v37 = vadd.f32 %v934_v8, %v900_v33  ;;  %v1000_v43 = vmul.f32 %v3311_v6, %v3274_v12 }
  0x8f   : > { %4372 = vst [vmem:[#allocation7_spill] sm:$0xff] %v3292_v62  ;;  %1399 = vperm.xlu2 %2380, %v3292_v62   ;;  %v1263_v5 = vadd.f32 %v2634_v42, %v1227_v9  ;;  %v771_v54 = vadd.f32 %v739_v34, %v705_v47  ;;  %v1067_v19 = vmul.f32 %v3320_v49, %v595_v63  ;;  %v3340_v34 = vld [vmem:[%s4286_s3 + $0xa] ss:$0 sm:$0xff] }
  0x90   : > { %v1133_v1 = vmul.f32 %v3326_v59, %v631_v57  ;;  %v1226_v15 = vadd.f32 %v1194_v16, %v1160_v56  ;;  %v1032_v7 = vadd.f32 %v1000_v43, %v966_v37  ;;  %v700_v42 = vmul.f32 %v3261_v27, %v3161_v51  ;;  %v3347_v51 = vld [vmem:[%s4287_s4] ss:$0 sm:$0xff] }
  0x91   : > { %v704_v47 = vmul.f32 %v3261_v27, %v594_v58  ;;  %v3332_v31 = vmax.f32 %v1263_v5, 0.0  ;;  %v3335_v32 = vmul.f32 %v3267_v30, %v595_v63  ;;  %v1199_v39 = vmul.f32 %v3340_v34, %v667_v29 }
  0x92   : > { %v738_v16 = vmul.f32 %v3279_v45, %v630_v17  ;;  %v1262_v33 = vadd.f32 %v3347_v51, %v1226_v15  ;;  %v1099_v8 = vadd.f32 %v1067_v19, %v1032_v7  ;;  %v766_v63 = vadd.f32 %v3186_v36, %v700_v42  ;;  %v536_v42 = vld [vmem:[%s2511_s8 + $0xf0] sm:$0xff] }
  0x93   : > { %4373 = vst [vmem:[#allocation12_spill] sm:$0xff] %v3332_v31  ;;  %v804_v9 = vmul.f32 %v3301_v35, %v666_v23  ;;  %1394 = vperm.xlu1 %2379, %v3332_v31   ;;  %v3353_v56 = vadd.f32 %v805_v40, %v771_v54  ;;  %v3356_v37 = vmul.f32 %v3287_v61, %v631_v57  ;;  %v3376_v54 = vld [vmem:[#allocation2 + $0x128] sm:$0xff] }
  0x94   : > { %v3359_v43 = vmul.f32 %v3311_v6, %v667_v29  ;;  %v770_v5 = vadd.f32 %v738_v16, %v704_v47  ;;  %v3361_v62 = vmax.f32 %v1262_v33, 0.0  ;;  %v1165_v19 = vadd.f32 %v1133_v1, %v1099_v8  ;;  %v537_v1 = vld [vmem:[%s2511_s8 + $0xf8] sm:$0xff]  ;;  %v598_v8 = vld [vmem:[#allocation2 + $0x140] sm:$0xff]  ;;  %569 = vst.msk [vmem:[#allocation2 + $0x181] sm:$0xff] %vm495_vm1, %v536_v42  ;;  %s2347_s8 = sadd.s32 240, %s2505_s28 }
  0x95   : > { %v832_v36 = vadd.f32 %v3195_v50, %v766_v63  ;;  %v3365_v15 = vmul.f32 %v3267_v30, %v594_v58  ;;  %v3368_v7 = vmul.f32 %v3287_v61, %v630_v17  ;;  %v3371_v40 = vmul.f32 %v3311_v6, %v666_v23  ;;  %v3383_v63 = vld [vmem:[#allocation2 + $0x129] sm:$0xff]  ;;  %v634_v31 = vld [vmem:[#allocation2 + $0x141] sm:$0xff]  ;;  %570 = vst.msk [vmem:[#allocation2 + $0x189] sm:$0xff] %vm495_vm1, %v537_v1  ;;  %s431_s18 = scalar_lea.vmem %s4285_s2, %s2347_s8 }
  0x96   : > { %4374 = vst [vmem:[#allocation13_spill] sm:$0xff] %v3361_v62  ;;  %v1066_v57 = vmul.f32 %v3320_v49, %v594_v58  ;;  %v898_v29 = vadd.f32 %v3230_v46, %v3123_v41  ;;  %1389 = vperm.xlu0 %2381, %v3361_v62   ;;  %v1231_v50 = vadd.f32 %v1199_v39, %v1165_v19  ;;  %v670_v42 = vld [vmem:[#allocation2 + $0x142] sm:$0xff]  ;;  %v633_v62 = vld [vmem:[#allocation2 + $0x139] sm:$0xff] }
  0x97   : > { %v836_v47 = vadd.f32 %v804_v9, %v770_v5  ;;  %v899_v16 = vadd.f32 %v3207_v21, %v832_v36  ;;  %v1132_v33 = vmul.f32 %v3326_v59, %v630_v17  ;;  %v1065_v41 = vmul.f32 %v3320_v49, %v3240_v26  ;;  %v3394_v9 = vld [vmem:[#allocation2 + $0x12a] sm:$0xff] }
  0x98   : > { %v964_v58 = vadd.f32 %v3233_v60, %v898_v29  ;;  %v708_v46 = vmul.f32 %v3261_v27, %v598_v8  ;;  %v742_v48 = vmul.f32 %v3279_v45, %v634_v31  ;;  %v1267_v39 = vadd.f32 %v3347_v51, %v1231_v50 }
  0x99   : > { %v965_v21 = vadd.f32 %v3210_v0, %v899_v16  ;;  %v1198_v17 = vmul.f32 %v3340_v34, %v666_v23  ;;  %v871_v60 = vmul.f32 %v3267_v30, %v3376_v54  ;;  %v1131_v19 = vmul.f32 %v3326_v59, %v3252_v28 }
  0x9a   : > { %v1030_v5 = vadd.f32 %v3244_v11, %v964_v58  ;;  %v1197_v36 = vmul.f32 %v3340_v34, %v3274_v12  ;;  %v937_v0 = vmul.f32 %v3287_v61, %v3383_v63  ;;  %v3406_v29 = vmax.f32 %v1267_v39, 0.0  ;;  %v597_v11 = vld [vmem:[#allocation2 + $0x138] sm:$0xff] }
  0x9b   : > { %v1031_v23 = vadd.f32 %v3227_v3, %v965_v21  ;;  %v3411_v50 = vmul.f32 %v3279_v45, %v3383_v63  ;;  %v903_v1 = vadd.f32 %v871_v60, %v836_v47  ;;  %v774_v58 = vadd.f32 %v742_v48, %v708_v46 }
  0x9c   : > { %4375 = vst [vmem:[#allocation15_spill] sm:$0xff] %v3406_v29  ;;  %v1097_v16 = vadd.f32 %v1065_v41, %v1030_v5  ;;  %v808_v28 = vmul.f32 %v3301_v35, %v670_v42  ;;  %v1003_v12 = vmul.f32 %v3311_v6, %v3394_v9  ;;  %1414 = vperm.xlu2 %2380, %v3406_v29  }
  0x9d   : > { %v1098_v39 = vadd.f32 %v1066_v57, %v1031_v23  ;;  %v3419_v3 = vmul.f32 %v3301_v35, %v3394_v9  ;;  %v969_v21 = vadd.f32 %v937_v0, %v903_v1  ;;  %v1070_v18 = vmul.f32 %v3320_v49, %v598_v8  ;;  %v669_v23 = vld [vmem:[#allocation2 + $0x13a] sm:$0xff] }
  0x9e   : > { %v1163_v47 = vadd.f32 %v1131_v19, %v1097_v16  ;;  %v3423_v41 = vmul.f32 %v3267_v30, %v598_v8  ;;  %v703_v48 = vmul.f32 %v3261_v27, %v3240_v26  ;;  %v707_v46 = vmul.f32 %v3261_v27, %v597_v11 }
  0x9f   : > { %v1164_v60 = vadd.f32 %v1132_v33, %v1098_v39  ;;  %v1035_v5 = vadd.f32 %v1003_v12, %v969_v21  ;;  %v1136_v57 = vmul.f32 %v3326_v59, %v634_v31  ;;  %v741_v29 = vmul.f32 %v3279_v45, %v633_v62 }
  0xa0   : > { %v1229_v25 = vadd.f32 %v1197_v36, %v1163_v47  ;;  %v3430_v0 = vadd.f32 %v808_v28, %v774_v58  ;;  %v3433_v19 = vmul.f32 %v3287_v61, %v634_v31  ;;  %v769_v8 = vadd.f32 %v3296_v10, %v703_v48 }
  0xa1   : > { %v1230_v1 = vadd.f32 %v1198_v17, %v1164_v60  ;;  %v3437_v26 = vmul.f32 %v3311_v6, %v670_v42  ;;  %v1102_v16 = vadd.f32 %v1070_v18, %v1035_v5  ;;  %v1202_v33 = vmul.f32 %v3340_v34, %v670_v42 }
  0xa2   : > { %v1265_v12 = vadd.f32 %v3347_v51, %v1229_v25  ;;  %v773_v39 = vadd.f32 %v741_v29, %v707_v46  ;;  %v807_v21 = vmul.f32 %v3301_v35, %v669_v23  ;;  %v835_v36 = vadd.f32 %v3305_v20, %v769_v8  ;;  %v3462_v46 = vld [vmem:[#allocation2 + $0x150] sm:$0xff] }
  0xa3   : > { %v1266_v58 = vadd.f32 %v3347_v51, %v1230_v1  ;;  %v1168_v31 = vadd.f32 %v1136_v57, %v1102_v16  ;;  %v3445_v28 = vmul.f32 %v3267_v30, %v597_v11  ;;  %v3448_v10 = vmul.f32 %v3287_v61, %v633_v62  ;;  %v637_v8 = vld [vmem:[#allocation2 + $0x169] sm:$0xff]  ;;  %v3474_v1 = vld [vmem:[#allocation2 + $0x152] sm:$0xff] }
  0xa4   : > { %v3450_v17 = vmax.f32 %v1265_v12, 0.0  ;;  %v902_v18 = vadd.f32 %v3335_v32, %v835_v36  ;;  %v3454_v25 = vmul.f32 %v3311_v6, %v669_v23  ;;  %v901_v29 = vadd.f32 %v3365_v15, %v3218_v44  ;;  %v601_v44 = vld [vmem:[#allocation2 + $0x168] sm:$0xff]  ;;  %v3469_v15 = vld [vmem:[#allocation2 + $0x151] sm:$0xff] }
  0xa5   : > { %v3458_v20 = vmax.f32 %v1266_v58, 0.0  ;;  %v1234_v42 = vadd.f32 %v1202_v33, %v1168_v31  ;;  %v1069_v47 = vmul.f32 %v3320_v49, %v597_v11  ;;  %v1135_v48 = vmul.f32 %v3326_v59, %v633_v62  ;;  %v673_v31 = vld [vmem:[#allocation2 + $0x16a] sm:$0xff] }
  0xa6   : > { %4376 = vst [vmem:[#allocation8_spill] sm:$0xff] %v3450_v17  ;;  %1404 = vperm.xlu0 %2381, %v3450_v17   ;;  %v839_v60 = vadd.f32 %v807_v21, %v773_v39  ;;  %v968_v32 = vadd.f32 %v3356_v37, %v902_v18  ;;  %v967_v5 = vadd.f32 %v3368_v7, %v901_v29  ;;  %v600_v29 = vld [vmem:[#allocation2 + $0x158] sm:$0xff] }
  0xa7   : > { %4377 = vst [vmem:[#allocation17_spill] sm:$0xff] %v3458_v20  ;;  %v1068_v57 = vmul.f32 %v3320_v49, %v3376_v54  ;;  %1409 = vperm.xlu1 %2379, %v3458_v20   ;;  %v1270_v62 = vadd.f32 %v3347_v51, %v1234_v42  ;;  %v1201_v11 = vmul.f32 %v3340_v34, %v669_v23  ;;  %v636_v42 = vld [vmem:[#allocation2 + $0x159] sm:$0xff] }
  0xa8   : > { %v711_v16 = vmul.f32 %v3261_v27, %v601_v44  ;;  %v745_v37 = vmul.f32 %v3279_v45, %v637_v8  ;;  %v1034_v7 = vadd.f32 %v3359_v43, %v968_v32  ;;  %v1033_v33 = vadd.f32 %v3371_v40, %v967_v5 }
  0xa9   : > { %v1134_v12 = vmul.f32 %v3326_v59, %v3383_v63  ;;  %v874_v39 = vmul.f32 %v3267_v30, %v3462_v46  ;;  %v3484_v21 = vmax.f32 %v1270_v62, 0.0  ;;  %v1200_v23 = vmul.f32 %v3340_v34, %v3394_v9 }
  0xaa   : > { %v3490_v36 = vmul.f32 %v3279_v45, %v3469_v15  ;;  %v940_v43 = vmul.f32 %v3287_v61, %v3469_v15  ;;  %v1101_v58 = vadd.f32 %v1069_v47, %v1034_v7  ;;  %v1100_v40 = vadd.f32 %v1068_v57, %v1033_v33  ;;  %v672_v33 = vld [vmem:[#allocation2 + $0x15a] sm:$0xff] }
  0xab   : > { %4378 = vst [vmem:[#allocation18_spill] sm:$0xff] %v3484_v21  ;;  %v906_v18 = vadd.f32 %v874_v39, %v839_v60  ;;  %v1006_v63 = vmul.f32 %v3311_v6, %v3474_v1  ;;  %1429 = vperm.xlu2 %2380, %v3484_v21   ;;  %v777_v32 = vadd.f32 %v745_v37, %v711_v16 }
  0xac   : > { %v3499_v9 = vmul.f32 %v3301_v35, %v3474_v1  ;;  %v811_v5 = vmul.f32 %v3301_v35, %v673_v31  ;;  %v3503_v62 = vmul.f32 %v3267_v30, %v601_v44  ;;  %v1167_v47 = vadd.f32 %v1135_v48, %v1101_v58 }
  0xad   : > { %v1166_v57 = vadd.f32 %v1134_v12, %v1100_v40  ;;  %v972_v60 = vadd.f32 %v940_v43, %v906_v18  ;;  %v1073_v7 = vmul.f32 %v3320_v49, %v601_v44  ;;  %v3507_v39 = vmul.f32 %v3287_v61, %v637_v8 }
  0xae   : > { %v706_v16 = vmul.f32 %v3261_v27, %v3376_v54  ;;  %v710_v37 = vmul.f32 %v3261_v27, %v600_v29  ;;  %v744_v21 = vmul.f32 %v3279_v45, %v636_v42  ;;  %v1233_v20 = vadd.f32 %v1201_v11, %v1167_v47  ;;  %v638_v47 = vld [vmem:[#allocation2 + $0x171] sm:$0xff] }
  0xaf   : > { %v1232_v17 = vadd.f32 %v1200_v23, %v1166_v57  ;;  %v1038_v24 = vadd.f32 %v1006_v63, %v972_v60  ;;  %v1139_v48 = vmul.f32 %v3326_v59, %v637_v8  ;;  %v3514_v12 = vadd.f32 %v811_v5, %v777_v32 }
  0xb0   : > { %v772_v44 = vadd.f32 %v3411_v50, %v706_v16  ;;  %v776_v43 = vadd.f32 %v744_v21, %v710_v37  ;;  %v810_v58 = vmul.f32 %v3301_v35, %v672_v33  ;;  %v1269_v40 = vadd.f32 %v3347_v51, %v1233_v20 }
  0xb1   : > { %v1268_v54 = vadd.f32 %v3347_v51, %v1232_v17  ;;  %v1105_v18 = vadd.f32 %v1073_v7, %v1038_v24  ;;  %v1205_v38 = vmul.f32 %v3340_v34, %v673_v31  ;;  %v3522_v11 = vmul.f32 %v3311_v6, %v673_v31  ;;  %v3535_v17 = vld [vmem:[#allocation2 + $0x170] sm:$0xff] }
  0xb2   : > { %v838_v23 = vadd.f32 %v3419_v3, %v772_v44  ;;  %v875_v8 = vmul.f32 %v3267_v30, %v600_v29  ;;  %v3527_v63 = vmul.f32 %v3287_v61, %v636_v42  ;;  %v3529_v50 = vmax.f32 %v1269_v40, 0.0 }
  0xb3   : > { %v3531_v21 = vmax.f32 %v1268_v54, 0.0  ;;  %v1171_v20 = vadd.f32 %v1139_v48, %v1105_v18  ;;  %v904_v24 = vadd.f32 %v3445_v28, %v3353_v56  ;;  %v842_v32 = vadd.f32 %v810_v58, %v776_v43  ;;  %v3547_v28 = vld [vmem:[#allocation2 + $0x172] sm:$0xff]  ;;  %v604_v48 = vld [vmem:[#allocation2 + $0x188] sm:$0xff] }
  0xb4   : > { %v905_v31 = vadd.f32 %v3423_v41, %v838_v23  ;;  %v3539_v3 = vmul.f32 %v3311_v6, %v672_v33  ;;  %v1072_v5 = vmul.f32 %v3320_v49, %v600_v29  ;;  %1424 = vperm.xlu1 %2379, %v3529_v50   ;;  %v1071_v56 = vmul.f32 %v3320_v49, %v3462_v46  ;;  %v3563_v43 = vld [vmem:[#allocation2 + $0x18a] sm:$0xff] }
  0xb5   : > { %1419 = vperm.xlu0 %2381, %v3531_v21   ;;  %v1237_v57 = vadd.f32 %v1205_v38, %v1171_v20  ;;  %v970_v60 = vadd.f32 %v3448_v10, %v904_v24  ;;  %v1138_v7 = vmul.f32 %v3326_v59, %v636_v42  ;;  %v1204_v29 = vmul.f32 %v3340_v34, %v672_v33  ;;  %v640_v33 = vld [vmem:[#allocation2 + $0x189] sm:$0xff] }
  0xb6   : > { %v971_v41 = vadd.f32 %v3433_v19, %v905_v31  ;;  %v877_v16 = vmul.f32 %v3267_v30, %v3535_v17  ;;  %v1137_v10 = vmul.f32 %v3326_v59, %v3469_v15  ;;  %v943_v44 = vmul.f32 %v3287_v61, %v638_v47  ;;  %v603_v31 = vld [vmem:[#allocation2 + $0x180] sm:$0xff] }
  0xb7   : > { %v1273_v37 = vadd.f32 %v3347_v51, %v1237_v57  ;;  %v1036_v38 = vadd.f32 %v3454_v25, %v970_v60  ;;  %v1203_v42 = vmul.f32 %v3340_v34, %v3474_v1  ;;  %v1009_v40 = vmul.f32 %v3311_v6, %v3547_v28  ;;  %v639_v60 = vld [vmem:[#allocation2 + $0x181] sm:$0xff] }
  0xb8   : > { %v1037_v19 = vadd.f32 %v3437_v26, %v971_v41  ;;  %v909_v58 = vadd.f32 %v877_v16, %v842_v32  ;;  %v746_v15 = vmul.f32 %v3279_v45, %v638_v47  ;;  %v812_v18 = vmul.f32 %v3301_v35, %v3547_v28 }
  0xb9   : > { %v3567_v25 = vmax.f32 %v1273_v37, 0.0  ;;  %v1103_v54 = vadd.f32 %v1071_v56, %v1036_v38  ;;  %v1076_v20 = vmul.f32 %v3320_v49, %v604_v48  ;;  %v709_v1 = vmul.f32 %v3261_v27, %v3462_v46  ;;  %v675_v56 = vld [vmem:[#allocation2 + $0x182] sm:$0xff] }
  0xba   : > { %v1104_v23 = vadd.f32 %v1072_v5, %v1037_v19  ;;  %v975_v26 = vadd.f32 %v943_v44, %v909_v58  ;;  %v879_v32 = vmul.f32 %v3267_v30, %v604_v48  ;;  %v1142_v45 = vmul.f32 %v3326_v59, %v640_v33  ;;  %v498_v48 = vld [vmem:[%s431_s18] sm:$0xff] }
  0xbb   : > { %1444 = vperm.xlu2 %2380, %v3567_v25   ;;  %v1169_v24 = vadd.f32 %v1137_v10, %v1103_v54  ;;  %v1208_v35 = vmul.f32 %v3340_v34, %v3563_v43  ;;  %v775_v46 = vadd.f32 %v3490_v36, %v709_v1  ;;  %v878_v41 = vmul.f32 %v3267_v30, %v603_v31 }
  0xbc   : > { %v1170_v5 = vadd.f32 %v1138_v7, %v1104_v23  ;;  %v1041_v57 = vadd.f32 %v1009_v40, %v975_v26  ;;  %v944_v37 = vmul.f32 %v3287_v61, %v639_v60  ;;  %v1010_v38 = vmul.f32 %v3311_v6, %v675_v56  ;;  %v499_v40 = vld [vmem:[%s431_s18 + $0x8] sm:$0xff] }
  0xbd   : > { %v1235_v16 = vadd.f32 %v1203_v42, %v1169_v24  ;;  %v907_v10 = vadd.f32 %v875_v8, %v3430_v0  ;;  %v841_v58 = vadd.f32 %v3499_v9, %v775_v46  ;;  %v1075_v7 = vmul.f32 %v3320_v49, %v603_v31 }
  0xbe   : > { %v1236_v44 = vadd.f32 %v1204_v29, %v1170_v5  ;;  %v1108_v19 = vadd.f32 %v1076_v20, %v1041_v57  ;;  %v1074_v30 = vmul.f32 %v3320_v49, %v3535_v17  ;;  %v1140_v42 = vmul.f32 %v3326_v59, %v638_v47 }
  0xbf   : > { %v1271_v54 = vadd.f32 %v3347_v51, %v1235_v16  ;;  %v973_v36 = vadd.f32 %v3527_v63, %v907_v10  ;;  %v908_v8 = vadd.f32 %v3503_v62, %v841_v58  ;;  %v501_v29 = vmul.f32 0.0, %v498_v48 }
  0xc0   : > { %v1272_v23 = vadd.f32 %v3347_v51, %v1236_v44  ;;  %v1174_v0 = vadd.f32 %v1142_v45, %v1108_v19  ;;  %v502_v20 = vmul.f32 0.0, %v499_v40  ;;  %v712_v1 = vmul.f32 %v3261_v27, %v3535_v17 }
  0xc1   : > { %v3597_v26 = vmax.f32 %v1271_v54, 0.0  ;;  %v1039_v9 = vadd.f32 %v3539_v3, %v973_v36  ;;  %v974_v31 = vadd.f32 %v3507_v39, %v908_v8  ;;  %504 = vst.msk [vmem:[#allocation2 + $0x199] sm:$0xff] %vm495_vm1, %v501_v29  ;;  %v910_v47 = vadd.f32 %v878_v41, %v3514_v12 }
  0xc2   : > { %v3602_v63 = vmax.f32 %v1272_v23, 0.0  ;;  %v1240_v24 = vadd.f32 %v1208_v35, %v1174_v0  ;;  %v1206_v45 = vmul.f32 %v3340_v34, %v3547_v28  ;;  %505 = vst.msk [vmem:[#allocation2 + $0x1a1] sm:$0xff] %vm495_vm1, %v502_v20  ;;  %v778_v3 = vadd.f32 %v746_v15, %v712_v1 }
  0xc3   : > { %1434 = vperm.xlu0 %2381, %v3597_v26   ;;  %v1106_v62 = vadd.f32 %v1074_v30, %v1039_v9  ;;  %v1040_v17 = vadd.f32 %v3522_v11, %v974_v31  ;;  %v1141_v39 = vmul.f32 %v3326_v59, %v639_v60  ;;  %v976_v35 = vadd.f32 %v944_v37, %v910_v47  ;;  %v3622_v60 = vpop.permute.xlu2 %1334 }
  0xc4   : > { %4379 = vst [vmem:[#allocation19_spill] sm:$0xff] %v3602_v63  ;;  %1439 = vperm.xlu1 %2379, %v3602_v63   ;;  %v1276_v27 = vadd.f32 %v3347_v51, %v1240_v24  ;;  %v945_v12 = vmul.f32 %v3287_v61, %v640_v33  ;;  %v844_v57 = vadd.f32 %v812_v18, %v778_v3  ;;  %v4382_v3 = vld [vmem:[#allocation3_spill] sm:$0xff] }
  0xc5   : > { %v1172_v5 = vadd.f32 %v1140_v42, %v1106_v62  ;;  %v1107_v41 = vadd.f32 %v1075_v7, %v1040_v17  ;;  %v1207_v28 = vmul.f32 %v3340_v34, %v675_v56  ;;  %v1011_v15 = vmul.f32 %v3311_v6, %v3563_v43 }
  0xc6   : > { %v3616_v46 = vmax.f32 %v1276_v27, 0.0  ;;  %v911_v10 = vadd.f32 %v879_v32, %v844_v57  ;;  %v1042_v48 = vadd.f32 %v1010_v38, %v976_v35  ;;  %v4383_v35 = vld [vmem:[#allocation16_spill] sm:$0xff]  ;;  %v4385_v57 = vld [vmem:[#allocation14_spill] sm:$0xff] }
  0xc7   : > { %v1238_v16 = vadd.f32 %v1206_v45, %v1172_v5  ;;  %v1173_v11 = vadd.f32 %v1141_v39, %v1107_v41  ;;  %v4386_v41 = vld [vmem:[#allocation10_spill] sm:$0xff] }
  0xc8   : > { %4380 = vst [vmem:[#allocation20_spill] sm:$0xff] %v3616_v46  ;;  %1459 = vperm.xlu2 %2380, %v3616_v46   ;;  %v977_v33 = vadd.f32 %v945_v12, %v911_v10  ;;  %v605_v18 = vld [vmem:[#allocation2 + $0x198] sm:$0xff]  ;;  %v4384_v12 = vld [vmem:[#allocation9_spill] sm:$0xff] }
  0xc9   : > { %v1274_v61 = vadd.f32 %v3347_v51, %v1238_v16  ;;  %v641_v37 = vld [vmem:[#allocation2 + $0x199] sm:$0xff]  ;;  %v1239_v44 = vadd.f32 %v1207_v28, %v1173_v11  ;;  %v642_v58 = vld [vmem:[#allocation2 + $0x1a1] sm:$0xff]  ;;  %v1077_v7 = vmul.f32 %v3320_v49, %v605_v18 }
  0xca   : > { %v606_v19 = vld [vmem:[#allocation2 + $0x1a0] sm:$0xff]  ;;  %v1143_v6 = vmul.f32 %v3326_v59, %v641_v37  ;;  %v1043_v32 = vadd.f32 %v1011_v15, %v977_v33  ;;  %v1144_v40 = vmul.f32 %v3326_v59, %v642_v58  ;;  %v4393_v58 = vld [vmem:[#allocation15_spill] sm:$0xff] }
  0xcb   : > { %v678_v56 = vld [vmem:[#allocation2 + $0x1a2] sm:$0xff]  ;;  %v3627_v43 = vmax.f32 %v1274_v61, 0.0  ;;  %v1078_v38 = vmul.f32 %v3320_v49, %v606_v19  ;;  %v677_v54 = vld [vmem:[#allocation2 + $0x19a] sm:$0xff]  ;;  %v1275_v36 = vadd.f32 %v3347_v51, %v1239_v44  ;;  %v1109_v30 = vadd.f32 %v1077_v7, %v1042_v48  ;;  %v3640_v24 = vpop.permute.xlu2 %1339  ;;  %v4390_v61 = vld [vmem:[#allocation7_spill] sm:$0xff] }
  0xcc   : > { %v1209_v42 = vmul.f32 %v3340_v34, %v677_v54  ;;  %v1210_v0 = vmul.f32 %v3340_v34, %v678_v56  ;;  %v2438_v49 = vmov 1   ;;  %v4387_v28 = vld [vmem:[#allocation5_spill] sm:$0xff]  ;;  %v4389_v48 = vld [vmem:[#allocation6_spill] sm:$0xff]  ;;  %v4391_v44 = vld [vmem:[#allocation8_spill] sm:$0xff] }
  0xcd   : > { %1449 = vperm.xlu0 %2381, %v3627_v43   ;;  %v1110_v23 = vadd.f32 %v1078_v38, %v1043_v32  ;;  %v3635_v8 = vmax.f32 %v1275_v36, 0.0  ;;  %v1175_v29 = vadd.f32 %v1143_v6, %v1109_v30  ;;  %v4388_v11 = vld [vmem:[#allocation13_spill] sm:$0xff]  ;;  %v4392_v19 = vld [vmem:[#allocation12_spill] sm:$0xff]  ;;  %v4395_v38 = vld [vmem:[#allocation18_spill] sm:$0xff] }
  0xce   : > { %v4394_v32 = vld [vmem:[#allocation17_spill] sm:$0xff] }
  0xcf   : > { %4381 = vst [vmem:[#allocation21_spill] sm:$0xff] %v3635_v8  ;;  %v1176_v9 = vadd.f32 %v1144_v40, %v1110_v23  ;;  %1454 = vperm.xlu1 %2379, %v3635_v8   ;;  %v1241_v59 = vadd.f32 %v1209_v42, %v1175_v29 }
  0xd0   : > { %2382 = vset.pattern.permute.xlu2 %v2438_v49 }
  0xd1   : > { %v1242_v20 = vadd.f32 %v1210_v0, %v1176_v9  ;;  %1506 = vperm.xlu2 %2382, %v3168_v22   ;;  %v1277_v1 = vadd.f32 %v3347_v51, %v1241_v59  ;;  %v3660_v27 = vpop.permute.xlu1 %1324  ;;  %v3720_v0 = vld [vmem:[%s4288_s5] sm:$0xf]  ;;  %v2439_v9 = vmov 2  }
  0xd2   : > { %4398 = vst [vmem:[#allocation14_spill] sm:$0xff] %v3720_v0  ;;  %v3724_v29 = vperm.slane %v3720_v0, 1 }
  0xd3   : > { %v1278_v31 = vadd.f32 %v3347_v51, %v1242_v20  ;;  %v3643_v47 = vmax.f32 %v1277_v1, 0.0  ;;  %v3650_v62 = vpop.permute.xlu2 %1354  ;;  %v3655_v51 = vpop.permute.xlu0 %1344 }
  0xd5   : > { %v3645_v34 = vmax.f32 %v1278_v31, 0.0  ;;  %1464 = vperm.xlu0 %2381, %v3643_v47  }
  0xd7   : > { %1469 = vperm.xlu1 %2379, %v3645_v34  }
  0xd9   : > { %1518 = vperm.xlu2 %2382, %v3025_v14   ;;  %v1330_v5 = vpop.permute.xlu1 %1329 }
  0xdb   : > { %v3657_v45 = vpop.permute.xlu2 %1369  ;;  %v3665_v17 = vpop.permute.xlu0 %1359 }
  0xdd   : > { %2383 = vset.pattern.permute.xlu0 %v2438_v49 }
  0xde   : > { %1510 = vperm.xlu0 %2383, %v3271_v53  }
  0xdf   : > { %2384 = vset.pattern.permute.xlu1 %v2438_v49  ;;  %v3728_v49 = vperm.slane %v3720_v0, 0 }
  0xe0   : > { %1514 = vperm.xlu1 %2384, %v2985_v55  }
  0xe1   : > { %1526 = vperm.xlu2 %2382, %v3011_v13   ;;  %v3678_v10 = vpop.permute.xlu1 %1349 }
  0xe3   : > { %v3667_v39 = vpop.permute.xlu2 %1384  ;;  %v3674_v15 = vpop.permute.xlu0 %1374 }
  0xe6   : > { %1530 = vperm.xlu0 %2383, %v4382_v3  }
  0xe8   : > { %1522 = vperm.xlu1 %2384, %v2976_v52  }
  0xe9   : > { %1538 = vperm.xlu2 %2382, %v3064_v2   ;;  %v3685_v37 = vpop.permute.xlu1 %1364 }
  0xeb   : > { %v3676_v16 = vpop.permute.xlu2 %1399 }
  0xee   : > { %1542 = vperm.xlu0 %2383, %v2956_v4  }
  0xef   : > { %v1315_v33 = vpop.permute.xlu0 %1314 }
  0xf0   : > { %1534 = vperm.xlu1 %2384, %v4383_v35   ;;  %v1473_v1 = vmul.f32 %v3728_v49, %v1315_v33 }
  0xf1   : > { %1550 = vperm.xlu2 %2382, %v4384_v12  }
  0xf4   : > { %v3695_v6 = vpop.permute.xlu1 %1379 }
  0xf6   : > { %1554 = vperm.xlu0 %2383, %v4385_v57   ;;  %v3683_v18 = vpop.permute.xlu2 %1414 }
  0xf8   : > { %1546 = vperm.xlu1 %2384, %v4386_v41  }
  0xf9   : > { %1562 = vperm.xlu2 %2382, %v4387_v28  }
  0xfe   : > { %1566 = vperm.xlu0 %2383, %v4388_v11  }
  0xff   : > { %v3690_v56 = vpop.permute.xlu0 %1319 }
 0x100   : > { %1558 = vperm.xlu1 %2384, %v4389_v48  }
 0x101   : > { %1574 = vperm.xlu2 %2382, %v4390_v61  }
 0x105   : > { %v3692_v7 = vpop.permute.xlu2 %1429  ;;  %v3706_v36 = vpop.permute.xlu1 %1394 }
 0x106   : > { %1578 = vperm.xlu0 %2383, %v4391_v44  }
 0x108   : > { %1570 = vperm.xlu1 %2384, %v4392_v19   ;;  %v3700_v40 = vpop.permute.xlu0 %1389 }
 0x109   : > { %1586 = vperm.xlu2 %2382, %v4393_v58  }
 0x10e   : > { %1590 = vperm.xlu0 %2383, %v3531_v21  }
 0x110   : > { %1582 = vperm.xlu1 %2384, %v4394_v32  }
 0x111   : > { %1598 = vperm.xlu2 %2382, %v4395_v38  }
 0x115   : > { %v3702_v54 = vpop.permute.xlu2 %1444 }
 0x116   : > { %1602 = vperm.xlu0 %2383, %v3597_v26  }
 0x118   : > { %1594 = vperm.xlu1 %2384, %v3529_v50   ;;  %v3711_v30 = vpop.permute.xlu0 %1404 }
 0x119   : > { %1610 = vperm.xlu2 %2382, %v3567_v25   ;;  %v3715_v23 = vpop.permute.xlu1 %1409 }
 0x11a   : > { %4397 = vst [vmem:[#allocation16_spill] sm:$0xff] %v3715_v23 }
 0x11e   : > { %1614 = vperm.xlu0 %2383, %v3627_v43  }
 0x120   : > { %1606 = vperm.xlu1 %2384, %v3602_v63  }
 0x121   : > { %1622 = vperm.xlu2 %2382, %v3616_v46  }
 0x122   : > { %v3713_v42 = vpop.permute.xlu2 %1459 }
 0x123   : > { %4396 = vst [vmem:[#allocation3_spill] sm:$0xff] %v3713_v42 }
 0x126   : > { %1626 = vperm.xlu0 %2383, %v3643_v47   ;;  %v3735_v23 = vpop.permute.xlu1 %1424 }
 0x127   : > { %v3731_v59 = vpop.permute.xlu0 %1419  ;;  %4400 = vst [vmem:[#allocation13_spill] sm:$0xff] %v3735_v23 }
 0x128   : > { %1618 = vperm.xlu1 %2384, %v3635_v8   ;;  %4399 = vst [vmem:[#allocation5_spill] sm:$0xff] %v3731_v59 }
 0x129   : > { %2385 = vset.pattern.permute.xlu2 %v2439_v9 }
 0x12a   : > { %1699 = vperm.xlu2 %2385, %v3168_v22   ;;  %v1476_v22 = vmul.f32 %v3728_v49, %v1330_v5 }
 0x12b   : > { %v1507_v20 = vpop.permute.xlu2 %1506 }
 0x12c   : > { %v1634_v31 = vmul.f32 %v3724_v29, %v1507_v20 }
 0x12e   : > { %v3737_v42 = vadd.f32 %v1634_v31, %v1473_v1  ;;  %2386 = vset.pattern.permute.xlu0 %v2439_v9  ;;  %v1478_v31 = vmul.f32 %v3728_v49, %v3640_v24 }
 0x12f   : > { %1703 = vperm.xlu0 %2386, %v3271_v53  }
 0x130   : > { %1630 = vperm.xlu1 %2384, %v3645_v34  }
 0x132   : > { %1711 = vperm.xlu2 %2385, %v3025_v14  }
 0x133   : > { %v1519_v8 = vpop.permute.xlu2 %1518 }
 0x134   : > { %v1637_v59 = vmul.f32 %v3724_v29, %v1519_v8 }
 0x135   : > { %v3744_v0 = vpop.permute.xlu0 %1434 }
 0x136   : > { %v3746_v33 = vadd.f32 %v1637_v59, %v1476_v22  ;;  %v3748_v20 = vpop.permute.xlu1 %1439  ;;  %v1481_v59 = vmul.f32 %v3728_v49, %v3650_v62 }
 0x137   : > { %4401 = vst [vmem:[#allocation6_spill] sm:$0xff] %v3748_v20  ;;  %1723 = vperm.xlu0 %2386, %v4382_v3  }
 0x138   : > { %2387 = vset.pattern.permute.xlu1 %v2439_v9 }
 0x139   : > { %1707 = vperm.xlu1 %2387, %v2985_v55  }
 0x13a   : > { %1719 = vperm.xlu2 %2385, %v3011_v13  }
 0x13b   : > { %v1527_v1 = vpop.permute.xlu2 %1526 }
 0x13c   : > { %v1639_v5 = vmul.f32 %v3724_v29, %v1527_v1 }
 0x13e   : > { %v3756_v8 = vadd.f32 %v1639_v5, %v1478_v31 }
 0x13f   : > { %v3758_v23 = vpop.permute.xlu0 %1449  ;;  %1735 = vperm.xlu0 %2386, %v2956_v4  }
 0x141   : > { %1715 = vperm.xlu1 %2387, %v2976_v52   ;;  %v3762_v22 = vpop.permute.xlu1 %1454 }
 0x142   : > { %4402 = vst [vmem:[#allocation7_spill] sm:$0xff] %v3762_v22  ;;  %1731 = vperm.xlu2 %2385, %v3064_v2   ;;  %v1484_v22 = vmul.f32 %v3728_v49, %v3657_v45 }
 0x143   : > { %v1539_v9 = vpop.permute.xlu2 %1538 }
 0x144   : > { %v1642_v24 = vmul.f32 %v3724_v29, %v1539_v9 }
 0x146   : > { %v3768_v20 = vadd.f32 %v1642_v24, %v1481_v59  ;;  %v1474_v59 = vmul.f32 %v3728_v49, %v3690_v56 }
 0x147   : > { %1747 = vperm.xlu0 %2386, %v4385_v57   ;;  %v3771_v1 = vpop.permute.xlu0 %1464 }
 0x149   : > { %1727 = vperm.xlu1 %2387, %v4383_v35   ;;  %v3774_v31 = vpop.permute.xlu1 %1469 }
 0x14a   : > { %4403 = vst [vmem:[#allocation8_spill] sm:$0xff] %v3774_v31  ;;  %1743 = vperm.xlu2 %2385, %v4384_v12   ;;  %v1475_v31 = vmul.f32 %v3728_v49, %v3660_v27  ;;  %v1479_v27 = vmul.f32 %v3728_v49, %v3655_v51 }
 0x14b   : > { %v1551_v5 = vpop.permute.xlu2 %1550 }
 0x14c   : > { %v1645_v62 = vmul.f32 %v3724_v29, %v1551_v5 }
 0x14e   : > { %v3780_v2 = vadd.f32 %v1645_v62, %v1484_v22  ;;  %v1487_v22 = vmul.f32 %v3728_v49, %v3667_v39 }
 0x14f   : > { %1759 = vperm.xlu0 %2386, %v4388_v11  }
 0x150   : > { %4404 = vst [vmem:[#allocation12_spill] sm:$0xff] %v3780_v2  ;;  %v1511_v9 = vpop.permute.xlu0 %1510 }
 0x151   : > { %1739 = vperm.xlu1 %2387, %v4386_v41   ;;  %v1635_v24 = vmul.f32 %v3724_v29, %v1511_v9 }
 0x152   : > { %1755 = vperm.xlu2 %2385, %v4387_v28   ;;  %v1515_v45 = vpop.permute.xlu1 %1514 }
 0x153   : > { %v1563_v12 = vpop.permute.xlu2 %1562  ;;  %v1636_v5 = vmul.f32 %v3724_v29, %v1515_v45  ;;  %v3793_v62 = vadd.f32 %v1635_v24, %v1474_v59  ;;  %v1477_v59 = vmul.f32 %v3728_v49, %v3622_v60  ;;  %v1490_v24 = vmul.f32 %v3728_v49, %v3676_v16 }
 0x154   : > { %v1648_v56 = vmul.f32 %v3724_v29, %v1563_v12  ;;  %v1482_v60 = vmul.f32 %v3728_v49, %v3665_v17 }
 0x155   : > { %v3796_v2 = vadd.f32 %v1636_v5, %v1475_v31 }
 0x156   : > { %v3798_v41 = vadd.f32 %v1648_v56, %v1487_v22 }
 0x157   : > { %1771 = vperm.xlu0 %2386, %v4391_v44  }
 0x158   : > { %v1531_v9 = vpop.permute.xlu0 %1530 }
 0x159   : > { %1751 = vperm.xlu1 %2387, %v4389_v48   ;;  %v1640_v39 = vmul.f32 %v3724_v29, %v1531_v9 }
 0x15a   : > { %1767 = vperm.xlu2 %2385, %v4390_v61   ;;  %v1523_v12 = vpop.permute.xlu1 %1522 }
 0x15b   : > { %v1575_v31 = vpop.permute.xlu2 %1574  ;;  %v1638_v45 = vmul.f32 %v3724_v29, %v1523_v12  ;;  %v3811_v22 = vadd.f32 %v1640_v39, %v1479_v27  ;;  %v1480_v27 = vmul.f32 %v3728_v49, %v3678_v10  ;;  %v1493_v12 = vmul.f32 %v3728_v49, %v3683_v18 }
 0x15c   : > { %v1651_v51 = vmul.f32 %v3724_v29, %v1575_v31  ;;  %v1485_v10 = vmul.f32 %v3728_v49, %v3674_v15 }
 0x15d   : > { %v3814_v5 = vadd.f32 %v1638_v45, %v1477_v59 }
 0x15e   : > { %v3816_v56 = vadd.f32 %v1651_v51, %v1490_v24 }
 0x15f   : > { %1783 = vperm.xlu0 %2386, %v3531_v21  }
 0x160   : > { %v1543_v9 = vpop.permute.xlu0 %1542 }
 0x161   : > { %1763 = vperm.xlu1 %2387, %v4392_v19   ;;  %v1643_v16 = vmul.f32 %v3724_v29, %v1543_v9 }
 0x162   : > { %1779 = vperm.xlu2 %2385, %v4393_v58   ;;  %v1535_v39 = vpop.permute.xlu1 %1534 }
 0x163   : > { %v1587_v59 = vpop.permute.xlu2 %1586  ;;  %v1641_v31 = vmul.f32 %v3724_v29, %v1535_v39  ;;  %v3829_v24 = vadd.f32 %v1643_v16, %v1482_v60  ;;  %v1483_v60 = vmul.f32 %v3728_v49, %v3685_v37  ;;  %v1496_v39 = vmul.f32 %v3728_v49, %v3692_v7 }
 0x164   : > { %v1654_v17 = vmul.f32 %v3724_v29, %v1587_v59  ;;  %v1488_v37 = vmul.f32 %v3728_v49, %v3700_v40 }
 0x165   : > { %v3832_v45 = vadd.f32 %v1641_v31, %v1480_v27 }
 0x166   : > { %v3834_v51 = vadd.f32 %v1654_v17, %v1493_v12 }
 0x167   : > { %1795 = vperm.xlu0 %2386, %v3597_v26  }
 0x168   : > { %v1555_v9 = vpop.permute.xlu0 %1554 }
 0x169   : > { %1775 = vperm.xlu1 %2387, %v4394_v32   ;;  %v1646_v18 = vmul.f32 %v3724_v29, %v1555_v9 }
 0x16a   : > { %1791 = vperm.xlu2 %2385, %v4395_v38   ;;  %v1547_v16 = vpop.permute.xlu1 %1546 }
 0x16b   : > { %v1599_v27 = vpop.permute.xlu2 %1598  ;;  %v1644_v59 = vmul.f32 %v3724_v29, %v1547_v16  ;;  %v3847_v12 = vadd.f32 %v1646_v18, %v1485_v10  ;;  %v1486_v10 = vmul.f32 %v3728_v49, %v3695_v6  ;;  %v1499_v16 = vmul.f32 %v3728_v49, %v3702_v54 }
 0x16c   : > { %v1657_v15 = vmul.f32 %v3724_v29, %v1599_v27  ;;  %v1491_v6 = vmul.f32 %v3728_v49, %v3711_v30 }
 0x16d   : > { %v3850_v31 = vadd.f32 %v1644_v59, %v1483_v60 }
 0x16e   : > { %v3852_v17 = vadd.f32 %v1657_v15, %v1496_v39 }
 0x16f   : > { %1807 = vperm.xlu0 %2386, %v3627_v43  }
 0x170   : > { %v1567_v9 = vpop.permute.xlu0 %1566 }
 0x171   : > { %1787 = vperm.xlu1 %2387, %v3529_v50   ;;  %v1649_v7 = vmul.f32 %v3724_v29, %v1567_v9 }
 0x172   : > { %1803 = vperm.xlu2 %2385, %v3567_v25   ;;  %v1559_v18 = vpop.permute.xlu1 %1558 }
 0x173   : > { %v1611_v60 = vpop.permute.xlu2 %1610  ;;  %v1647_v27 = vmul.f32 %v3724_v29, %v1559_v18  ;;  %v3865_v39 = vadd.f32 %v1649_v7, %v1488_v37  ;;  %v1489_v37 = vmul.f32 %v3728_v49, %v3706_v36  ;;  %v4407_v18 = vld [vmem:[#allocation3_spill] sm:$0xff] }
 0x174   : > { %v1660_v40 = vmul.f32 %v3724_v29, %v1611_v60  ;;  %v1502_v60 = vmul.f32 %v3728_v49, %v4407_v18 }
 0x175   : > { %v3868_v59 = vadd.f32 %v1647_v27, %v1486_v10 }
 0x176   : > { %v3870_v15 = vadd.f32 %v1660_v40, %v1499_v16 }
 0x177   : > { %4405 = vst [vmem:[#allocation15_spill] sm:$0xff] %v3868_v59  ;;  %1819 = vperm.xlu0 %2386, %v3643_v47   ;;  %v4410_v59 = vld [vmem:[#allocation5_spill] sm:$0xff] }
 0x178   : > { %4406 = vst [vmem:[#allocation17_spill] sm:$0xff] %v3870_v15  ;;  %v1579_v9 = vpop.permute.xlu0 %1578  ;;  %v1494_v18 = vmul.f32 %v3728_v49, %v4410_v59 }
 0x179   : > { %1799 = vperm.xlu1 %2387, %v3602_v63   ;;  %v1652_v54 = vmul.f32 %v3724_v29, %v1579_v9  ;;  %v2440_v9 = vmov 3  }
 0x17a   : > { %1815 = vperm.xlu2 %2385, %v3616_v46   ;;  %v1571_v7 = vpop.permute.xlu1 %1570  ;;  %v4409_v46 = vld [vmem:[#allocation14_spill] sm:$0xff] }
 0x17b   : > { %v1623_v10 = vpop.permute.xlu2 %1622  ;;  %v1650_v16 = vmul.f32 %v3724_v29, %v1571_v7  ;;  %v3883_v27 = vadd.f32 %v1652_v54, %v1491_v6  ;;  %v3892_v15 = vperm.slane %v4409_v46, 2  ;;  %v4411_v7 = vld [vmem:[#allocation21_spill] sm:$0xff] }
 0x17c   : > { %v1663_v30 = vmul.f32 %v3724_v29, %v1623_v10  ;;  %v4413_v10 = vld [vmem:[#allocation16_spill] sm:$0xff] }
 0x17d   : > { %v3886_v40 = vadd.f32 %v1650_v16, %v1489_v37  ;;  %v4412_v37 = vld [vmem:[#allocation11_spill] sm:$0xff] }
 0x17e   : > { %v3888_v63 = vadd.f32 %v1663_v30, %v1502_v60  ;;  %v1492_v60 = vmul.f32 %v3728_v49, %v4413_v10 }
 0x17f   : > { %2389 = vset.pattern.permute.xlu0 %v2440_v9 }
 0x180   : > { %4408 = vst [vmem:[#allocation18_spill] sm:$0xff] %v3888_v63  ;;  %1896 = vperm.xlu0 %2389, %v3271_v53   ;;  %v1591_v36 = vpop.permute.xlu0 %1590 }
 0x181   : > { %1811 = vperm.xlu1 %2387, %v4411_v7   ;;  %v1655_v6 = vmul.f32 %v3724_v29, %v1591_v36 }
 0x182   : > { %2388 = vset.pattern.permute.xlu2 %v2440_v9  ;;  %v1583_v54 = vpop.permute.xlu1 %1582 }
 0x183   : > { %1892 = vperm.xlu2 %2388, %v4412_v37   ;;  %v1653_v53 = vmul.f32 %v3724_v29, %v1583_v54  ;;  %v3902_v16 = vadd.f32 %v1655_v6, %v1494_v18  ;;  %v1497_v37 = vmul.f32 %v3728_v49, %v3744_v0  ;;  %v4414_v6 = vld [vmem:[#allocation13_spill] sm:$0xff] }
 0x184   : > { %v1700_v30 = vpop.permute.xlu2 %1699  ;;  %v1495_v10 = vmul.f32 %v3728_v49, %v4414_v6 }
 0x185   : > { %v1827_v46 = vmul.f32 %v3892_v15, %v1700_v30  ;;  %v3905_v63 = vadd.f32 %v1653_v53, %v1492_v60 }
 0x187   : > { %v3908_v59 = vadd.f32 %v1827_v46, %v3737_v42 }
 0x188   : > { %1916 = vperm.xlu0 %2389, %v4382_v3   ;;  %v1603_v36 = vpop.permute.xlu0 %1602 }
 0x189   : > { %1823 = vperm.xlu1 %2387, %v3645_v34   ;;  %v1658_v54 = vmul.f32 %v3724_v29, %v1603_v36 }
 0x18a   : > { %v1595_v18 = vpop.permute.xlu1 %1594 }
 0x18b   : > { %1904 = vperm.xlu2 %2388, %v3025_v14   ;;  %v1656_v60 = vmul.f32 %v3724_v29, %v1595_v18  ;;  %v3919_v46 = vadd.f32 %v1658_v54, %v1497_v37  ;;  %v1500_v14 = vmul.f32 %v3728_v49, %v3758_v23  ;;  %v4415_v54 = vld [vmem:[#allocation6_spill] sm:$0xff] }
 0x18c   : > { %v1712_v42 = vpop.permute.xlu2 %1711  ;;  %v1498_v18 = vmul.f32 %v3728_v49, %v4415_v54 }
 0x18d   : > { %v1830_v3 = vmul.f32 %v3892_v15, %v1712_v42  ;;  %v3922_v53 = vadd.f32 %v1656_v60, %v1495_v10 }
 0x18f   : > { %v3925_v0 = vadd.f32 %v1830_v3, %v3746_v33  ;;  %v4416_v3 = vld [vmem:[#allocation4_spill] sm:$0xff] }
 0x190   : > { %1928 = vperm.xlu0 %2389, %v2956_v4   ;;  %v1615_v30 = vpop.permute.xlu0 %1614 }
 0x191   : > { %2390 = vset.pattern.permute.xlu1 %v2440_v9  ;;  %v1661_v36 = vmul.f32 %v3724_v29, %v1615_v30  ;;  %v4417_v30 = vld [vmem:[#allocation7_spill] sm:$0xff] }
 0x192   : > { %1900 = vperm.xlu1 %2390, %v2985_v55   ;;  %v1607_v37 = vpop.permute.xlu1 %1606 }
 0x193   : > { %1912 = vperm.xlu2 %2388, %v3011_v13   ;;  %v1659_v33 = vmul.f32 %v3724_v29, %v1607_v37  ;;  %v3936_v6 = vadd.f32 %v1661_v36, %v1500_v14  ;;  %v1503_v13 = vmul.f32 %v3728_v49, %v3771_v1  ;;  %v1501_v14 = vmul.f32 %v3728_v49, %v4417_v30 }
 0x194   : > { %v1720_v4 = vpop.permute.xlu2 %1719 }
 0x195   : > { %v1832_v10 = vmul.f32 %v3892_v15, %v1720_v4  ;;  %v3939_v60 = vadd.f32 %v1659_v33, %v1498_v18  ;;  %v4418_v4 = vld [vmem:[#allocation9_spill] sm:$0xff] }
 0x197   : > { %v3942_v23 = vadd.f32 %v1832_v10, %v3756_v8  ;;  %v4419_v10 = vld [vmem:[#allocation8_spill] sm:$0xff] }
 0x198   : > { %1940 = vperm.xlu0 %2389, %v4385_v57   ;;  %v1627_v55 = vpop.permute.xlu0 %1626 }
 0x199   : > { %v1664_v9 = vmul.f32 %v3724_v29, %v1627_v55  ;;  %v1504_v55 = vmul.f32 %v3728_v49, %v4419_v10 }
 0x19a   : > { %1908 = vperm.xlu1 %2390, %v2976_v52   ;;  %v1619_v42 = vpop.permute.xlu1 %1618 }
 0x19b   : > { %1924 = vperm.xlu2 %2388, %v4416_v3   ;;  %v1662_v36 = vmul.f32 %v3724_v29, %v1619_v42  ;;  %v3953_v8 = vadd.f32 %v1664_v9, %v1503_v13  ;;  %v4420_v3 = vld [vmem:[#allocation12_spill] sm:$0xff] }
 0x19c   : > { %v1732_v37 = vpop.permute.xlu2 %1731 }
 0x19d   : > { %v1835_v57 = vmul.f32 %v3892_v15, %v1732_v37  ;;  %v3956_v54 = vadd.f32 %v1662_v36, %v1501_v14  ;;  %v4421_v14 = vld [vmem:[#allocation10_spill] sm:$0xff] }
 0x19f   : > { %v3959_v1 = vadd.f32 %v1835_v57, %v3768_v20 }
 0x1a0   : > { %1952 = vperm.xlu0 %2389, %v4388_v11  }
 0x1a1   : > { %v1704_v52 = vpop.permute.xlu0 %1703 }
 0x1a2   : > { %1920 = vperm.xlu1 %2390, %v4383_v35   ;;  %v1631_v18 = vpop.permute.xlu1 %1630  ;;  %v1828_v33 = vmul.f32 %v3892_v15, %v1704_v52 }
 0x1a3   : > { %1936 = vperm.xlu2 %2388, %v4418_v4   ;;  %v1665_v13 = vmul.f32 %v3724_v29, %v1631_v18 }
 0x1a4   : > { %v1744_v9 = vpop.permute.xlu2 %1743  ;;  %v3969_v42 = vadd.f32 %v1828_v33, %v3793_v62 }
 0x1a5   : > { %v1838_v20 = vmul.f32 %v3892_v15, %v1744_v9  ;;  %v3972_v11 = vadd.f32 %v1665_v13, %v1504_v55 }
 0x1a7   : > { %v3975_v35 = vadd.f32 %v1838_v20, %v4420_v3 }
 0x1a8   : > { %1964 = vperm.xlu0 %2389, %v4391_v44  }
 0x1a9   : > { %v1724_v30 = vpop.permute.xlu0 %1723 }
 0x1aa   : > { %1932 = vperm.xlu1 %2390, %v4421_v14   ;;  %v1833_v49 = vmul.f32 %v3892_v15, %v1724_v30 }
 0x1ab   : > { %1948 = vperm.xlu2 %2388, %v4387_v28   ;;  %v1708_v29 = vpop.permute.xlu1 %1707 }
 0x1ac   : > { %v1756_v36 = vpop.permute.xlu2 %1755  ;;  %v1829_v62 = vmul.f32 %v3892_v15, %v1708_v29  ;;  %v3983_v37 = vadd.f32 %v1833_v49, %v3811_v22 }
 0x1ad   : > { %v1841_v57 = vmul.f32 %v3892_v15, %v1756_v36 }
 0x1ae   : > { %v3987_v52 = vadd.f32 %v1829_v62, %v3796_v2 }
 0x1af   : > { %v3990_v44 = vadd.f32 %v1841_v57, %v3798_v41  ;;  %v4424_v57 = vld [vmem:[#allocation19_spill] sm:$0xff] }
 0x1b0   : > { %1976 = vperm.xlu0 %2389, %v3531_v21  }
 0x1b1   : > { %v1736_v18 = vpop.permute.xlu0 %1735 }
 0x1b2   : > { %1944 = vperm.xlu1 %2390, %v4389_v48   ;;  %v1836_v28 = vmul.f32 %v3892_v15, %v1736_v18  ;;  %v4425_v18 = vld [vmem:[#allocation20_spill] sm:$0xff] }
 0x1b3   : > { %1960 = vperm.xlu2 %2388, %v4390_v61   ;;  %v1716_v33 = vpop.permute.xlu1 %1715 }
 0x1b4   : > { %v1768_v22 = vpop.permute.xlu2 %1767  ;;  %v1831_v4 = vmul.f32 %v3892_v15, %v1716_v33  ;;  %v3998_v10 = vadd.f32 %v1836_v28, %v3829_v24 }
 0x1b5   : > { %v1844_v2 = vmul.f32 %v3892_v15, %v1768_v22 }
 0x1b6   : > { %v4002_v41 = vadd.f32 %v1831_v4, %v3814_v5 }
 0x1b7   : > { %v4005_v21 = vadd.f32 %v1844_v2, %v3816_v56 }
 0x1b8   : > { %1988 = vperm.xlu0 %2389, %v3597_v26  }
 0x1b9   : > { %v1748_v48 = vpop.permute.xlu0 %1747 }
 0x1ba   : > { %1956 = vperm.xlu1 %2390, %v4392_v19   ;;  %v1839_v61 = vmul.f32 %v3892_v15, %v1748_v48  ;;  %v4426_v48 = vld [vmem:[#allocation18_spill] sm:$0xff] }
 0x1bb   : > { %1972 = vperm.xlu2 %2388, %v4393_v58   ;;  %v1728_v55 = vpop.permute.xlu1 %1727 }
 0x1bc   : > { %v1780_v24 = vpop.permute.xlu2 %1779  ;;  %v1834_v13 = vmul.f32 %v3892_v15, %v1728_v55  ;;  %v4013_v9 = vadd.f32 %v1839_v61, %v3847_v12 }
 0x1bd   : > { %v1847_v5 = vmul.f32 %v3892_v15, %v1780_v24  ;;  %v4427_v24 = vld [vmem:[#allocation14_spill] sm:$0xff] }
 0x1be   : > { %v4017_v56 = vadd.f32 %v1834_v13, %v3832_v45  ;;  %v4067_v13 = vperm.slane %v4427_v24, 3 }
 0x1bf   : > { %v4020_v26 = vadd.f32 %v1847_v5, %v3834_v51 }
 0x1c0   : > { %2000 = vperm.xlu0 %2389, %v3627_v43  }
 0x1c1   : > { %v1760_v19 = vpop.permute.xlu0 %1759 }
 0x1c2   : > { %1968 = vperm.xlu1 %2390, %v4394_v32   ;;  %v1842_v58 = vmul.f32 %v3892_v15, %v1760_v19 }
 0x1c3   : > { %1984 = vperm.xlu2 %2388, %v4395_v38   ;;  %v1740_v20 = vpop.permute.xlu1 %1739 }
 0x1c4   : > { %v1792_v12 = vpop.permute.xlu2 %1791  ;;  %v1837_v3 = vmul.f32 %v3892_v15, %v1740_v20  ;;  %v4028_v30 = vadd.f32 %v1842_v58, %v3865_v39  ;;  %v4078_v20 = vld [vmem:[%s4289_s6] ss:$0 sm:$0xff] }
 0x1c5   : > { %v1850_v45 = vmul.f32 %v3892_v15, %v1792_v12 }
 0x1c6   : > { %v4032_v51 = vadd.f32 %v1837_v3, %v3850_v31 }
 0x1c7   : > { %v4035_v43 = vadd.f32 %v1850_v45, %v3852_v17  ;;  %v4422_v17 = vld [vmem:[#allocation15_spill] sm:$0xff] }
 0x1c8   : > { %2012 = vperm.xlu0 %2389, %v3643_v47   ;;  %v4423_v47 = vld [vmem:[#allocation17_spill] sm:$0xff] }
 0x1c9   : > { %v1772_v32 = vpop.permute.xlu0 %1771 }
 0x1ca   : > { %1980 = vperm.xlu1 %2390, %v3529_v50   ;;  %v1845_v38 = vmul.f32 %v3892_v15, %v1772_v32 }
 0x1cb   : > { %1996 = vperm.xlu2 %2388, %v3567_v25   ;;  %v1752_v14 = vpop.permute.xlu1 %1751 }
 0x1cc   : > { %v1804_v39 = vpop.permute.xlu2 %1803  ;;  %v1840_v49 = vmul.f32 %v3892_v15, %v1752_v14  ;;  %v4043_v29 = vadd.f32 %v1845_v38, %v3883_v27 }
 0x1cd   : > { %v1853_v31 = vmul.f32 %v3892_v15, %v1804_v39 }
 0x1ce   : > { %v4047_v36 = vadd.f32 %v1840_v49, %v4422_v17 }
 0x1cf   : > { %v4050_v62 = vadd.f32 %v1853_v31, %v4423_v47 }
 0x1d1   : > { %v1784_v50 = vpop.permute.xlu0 %1783 }
 0x1d2   : > { %1992 = vperm.xlu1 %2390, %v4424_v57   ;;  %v1848_v25 = vmul.f32 %v3892_v15, %v1784_v50 }
 0x1d3   : > { %2008 = vperm.xlu2 %2388, %v4425_v18   ;;  %v1764_v28 = vpop.permute.xlu1 %1763 }
 0x1d4   : > { %v1816_v33 = vpop.permute.xlu2 %1815  ;;  %v1843_v27 = vmul.f32 %v3892_v15, %v1764_v28  ;;  %v4057_v22 = vadd.f32 %v1848_v25, %v3902_v16 }
 0x1d5   : > { %v1856_v4 = vmul.f32 %v3892_v15, %v1816_v33 }
 0x1d6   : > { %v4061_v2 = vadd.f32 %v1843_v27, %v3886_v40 }
 0x1d7   : > { %v4064_v61 = vadd.f32 %v1856_v4, %v4426_v48 }
 0x1d9   : > { %v1796_v55 = vpop.permute.xlu0 %1795 }
 0x1da   : > { %2004 = vperm.xlu1 %2390, %v4411_v7   ;;  %v1851_v5 = vmul.f32 %v3892_v15, %v1796_v55 }
 0x1db   : > { %v1776_v19 = vpop.permute.xlu1 %1775 }
 0x1dc   : > { %v1846_v16 = vmul.f32 %v3892_v15, %v1776_v19  ;;  %v4073_v58 = vadd.f32 %v1851_v5, %v3919_v46 }
 0x1dd   : > { %v1893_v40 = vpop.permute.xlu2 %1892 }
 0x1de   : > { %v2020_v12 = vmul.f32 %v4067_v13, %v1893_v40  ;;  %v4082_v3 = vadd.f32 %v1846_v16, %v3905_v63 }
 0x1e0   : > { %v2052_v7 = vadd.f32 %v2020_v12, %v3908_v59 }
 0x1e1   : > { %v1808_v45 = vpop.permute.xlu0 %1807 }
 0x1e2   : > { %v2088_v32 = vadd.f32 %v4078_v20, %v2052_v7  ;;  %2016 = vperm.xlu1 %2390, %v3645_v34   ;;  %v1854_v46 = vmul.f32 %v3892_v15, %v1808_v45 }
 0x1e3   : > { %v1788_v38 = vpop.permute.xlu1 %1787 }
 0x1e4   : > { %v2120_v14 = vmax.f32 %v2088_v32, 0.0  ;;  %v1849_v63 = vmul.f32 %v3892_v15, %v1788_v38  ;;  %v4096_v59 = vadd.f32 %v1854_v46, %v3936_v6 }
 0x1e5   : > { %v1905_v39 = vpop.permute.xlu2 %1904 }
 0x1e6   : > { %2153 = vst.msk [vmem:[%s4092_s29] sm:$0xff] %vm2152_vm2, %v2120_v14  ;;  %v2023_v34 = vmul.f32 %v4067_v13, %v1905_v39  ;;  %v4102_v49 = vadd.f32 %v1849_v63, %v3922_v53 }
 0x1e8   : > { %v2055_v31 = vadd.f32 %v2023_v34, %v3925_v0 }
 0x1e9   : > { %v1820_v17 = vpop.permute.xlu0 %1819 }
 0x1ea   : > { %v2091_v47 = vadd.f32 %v4078_v20, %v2055_v31  ;;  %v1857_v50 = vmul.f32 %v3892_v15, %v1820_v17 }
 0x1eb   : > { %v1800_v57 = vpop.permute.xlu1 %1799 }
 0x1ec   : > { %v2123_v25 = vmax.f32 %v2091_v47, 0.0  ;;  %v1852_v6 = vmul.f32 %v3892_v15, %v1800_v57  ;;  %v4109_v18 = vadd.f32 %v1857_v50, %v3953_v8 }
 0x1ed   : > { %v1913_v28 = vpop.permute.xlu2 %1912 }
 0x1ee   : > { %2156 = vst.msk [vmem:[%s4092_s29 + $0x18] sm:$0xff] %vm2152_vm2, %v2123_v25  ;;  %v2025_v53 = vmul.f32 %v4067_v13, %v1913_v28  ;;  %v4115_v0 = vadd.f32 %v1852_v6, %v3939_v60 }
 0x1f0   : > { %v2057_v33 = vadd.f32 %v2025_v53, %v3942_v23 }
 0x1f2   : > { %v2093_v27 = vadd.f32 %v4078_v20, %v2057_v33  ;;  %v1897_v4 = vpop.permute.xlu0 %1896 }
 0x1f3   : > { %v1812_v48 = vpop.permute.xlu1 %1811  ;;  %v2021_v24 = vmul.f32 %v4067_v13, %v1897_v4 }
 0x1f4   : > { %v2125_v55 = vmax.f32 %v2093_v27, 0.0  ;;  %v1855_v8 = vmul.f32 %v3892_v15, %v1812_v48 }
 0x1f5   : > { %v1925_v5 = vpop.permute.xlu2 %1924  ;;  %v2053_v19 = vadd.f32 %v2021_v24, %v3969_v42 }
 0x1f6   : > { %2158 = vst.msk [vmem:[%s4092_s29 + $0x28] sm:$0xff] %vm2152_vm2, %v2125_v55  ;;  %v2028_v60 = vmul.f32 %v4067_v13, %v1925_v5  ;;  %v4126_v23 = vadd.f32 %v1855_v8, %v3956_v54 }
 0x1f7   : > { %v2089_v16 = vadd.f32 %v4078_v20, %v2053_v19 }
 0x1f8   : > { %v2060_v40 = vadd.f32 %v2028_v60, %v3959_v1 }
 0x1f9   : > { %v2121_v12 = vmax.f32 %v2089_v16, 0.0 }
 0x1fa   : > { %v2096_v7 = vadd.f32 %v4078_v20, %v2060_v40  ;;  %v1917_v45 = vpop.permute.xlu0 %1916 }
 0x1fb   : > { %2154 = vst.msk [vmem:[%s4092_s29 + $0x8] sm:$0xff] %vm2152_vm2, %v2121_v12  ;;  %v1824_v32 = vpop.permute.xlu1 %1823  ;;  %v2026_v42 = vmul.f32 %v4067_v13, %v1917_v45 }
 0x1fc   : > { %v2128_v46 = vmax.f32 %v2096_v7, 0.0  ;;  %v1858_v38 = vmul.f32 %v3892_v15, %v1824_v32 }
 0x1fd   : > { %v1937_v14 = vpop.permute.xlu2 %1936  ;;  %v2058_v54 = vadd.f32 %v2026_v42, %v3983_v37 }
 0x1fe   : > { %2161 = vst.msk [vmem:[%s4092_s29 + $0x40] sm:$0xff] %vm2152_vm2, %v2128_v46  ;;  %v2031_v1 = vmul.f32 %v4067_v13, %v1937_v14  ;;  %v4140_v63 = vadd.f32 %v1858_v38, %v3972_v11 }
 0x1ff   : > { %v2094_v39 = vadd.f32 %v4078_v20, %v2058_v54 }
 0x200   : > { %v2063_v34 = vadd.f32 %v2031_v1, %v3975_v35 }
 0x201   : > { %v2126_v31 = vmax.f32 %v2094_v39, 0.0 }
 0x202   : > { %v2099_v17 = vadd.f32 %v4078_v20, %v2063_v34  ;;  %v1929_v47 = vpop.permute.xlu0 %1928 }
 0x203   : > { %2159 = vst.msk [vmem:[%s4092_s29 + $0x30] sm:$0xff] %vm2152_vm2, %v2126_v31  ;;  %v2029_v50 = vmul.f32 %v4067_v13, %v1929_v47 }
 0x204   : > { %v2131_v15 = vmax.f32 %v2099_v17, 0.0  ;;  %v1901_v37 = vpop.permute.xlu1 %1900 }
 0x205   : > { %v1949_v57 = vpop.permute.xlu2 %1948  ;;  %v2022_v25 = vmul.f32 %v4067_v13, %v1901_v37  ;;  %v2061_v11 = vadd.f32 %v2029_v50, %v3998_v10 }
 0x206   : > { %2164 = vst.msk [vmem:[%s4092_s29 + $0x58] sm:$0xff] %vm2152_vm2, %v2131_v15  ;;  %v2034_v35 = vmul.f32 %v4067_v13, %v1949_v57 }
 0x207   : > { %v2054_v6 = vadd.f32 %v2022_v25, %v3987_v52  ;;  %v2097_v28 = vadd.f32 %v4078_v20, %v2061_v11 }
 0x208   : > { %v2066_v53 = vadd.f32 %v2034_v35, %v3990_v44 }
 0x209   : > { %v2090_v33 = vadd.f32 %v4078_v20, %v2054_v6  ;;  %v2129_v27 = vmax.f32 %v2097_v28, 0.0 }
 0x20a   : > { %v2102_v4 = vadd.f32 %v4078_v20, %v2066_v53  ;;  %v1941_v48 = vpop.permute.xlu0 %1940 }
 0x20b   : > { %v2122_v55 = vmax.f32 %v2090_v33, 0.0  ;;  %2162 = vst.msk [vmem:[%s4092_s29 + $0x48] sm:$0xff] %vm2152_vm2, %v2129_v27  ;;  %v2032_v10 = vmul.f32 %v4067_v13, %v1941_v48 }
 0x20c   : > { %v2134_v24 = vmax.f32 %v2102_v4, 0.0  ;;  %v1909_v8 = vpop.permute.xlu1 %1908 }
 0x20d   : > { %v1961_v52 = vpop.permute.xlu2 %1960  ;;  %2155 = vst.msk [vmem:[%s4092_s29 + $0x10] sm:$0xff] %vm2152_vm2, %v2122_v55  ;;  %v2024_v5 = vmul.f32 %v4067_v13, %v1909_v8  ;;  %v2064_v44 = vadd.f32 %v2032_v10, %v4013_v9 }
 0x20e   : > { %v2037_v19 = vmul.f32 %v4067_v13, %v1961_v52  ;;  %2167 = vst.msk [vmem:[%s4092_s29 + $0x70] sm:$0xff] %vm2152_vm2, %v2134_v24 }
 0x20f   : > { %v2056_v60 = vadd.f32 %v2024_v5, %v4002_v41  ;;  %v2100_v16 = vadd.f32 %v4078_v20, %v2064_v44 }
 0x210   : > { %v2069_v40 = vadd.f32 %v2037_v19, %v4005_v21 }
 0x211   : > { %v2092_v12 = vadd.f32 %v4078_v20, %v2056_v60  ;;  %v2132_v7 = vmax.f32 %v2100_v16, 0.0 }
 0x212   : > { %v2105_v45 = vadd.f32 %v4078_v20, %v2069_v40  ;;  %v1953_v32 = vpop.permute.xlu0 %1952 }
 0x213   : > { %v2124_v46 = vmax.f32 %v2092_v12, 0.0  ;;  %2165 = vst.msk [vmem:[%s4092_s29 + $0x60] sm:$0xff] %vm2152_vm2, %v2132_v7  ;;  %v2035_v42 = vmul.f32 %v4067_v13, %v1953_v32 }
 0x214   : > { %v2137_v9 = vmax.f32 %v2105_v45, 0.0  ;;  %v1921_v38 = vpop.permute.xlu1 %1920 }
 0x215   : > { %v1973_v41 = vpop.permute.xlu2 %1972  ;;  %2157 = vst.msk [vmem:[%s4092_s29 + $0x20] sm:$0xff] %vm2152_vm2, %v2124_v46  ;;  %v2027_v14 = vmul.f32 %v4067_v13, %v1921_v38  ;;  %v2067_v21 = vadd.f32 %v2035_v42, %v4028_v30 }
 0x216   : > { %v2040_v54 = vmul.f32 %v4067_v13, %v1973_v41  ;;  %2170 = vst.msk [vmem:[%s4092_s29 + $0x88] sm:$0xff] %vm2152_vm2, %v2137_v9 }
 0x217   : > { %v2059_v1 = vadd.f32 %v2027_v14, %v4017_v56  ;;  %v2103_v39 = vadd.f32 %v4078_v20, %v2067_v21 }
 0x218   : > { %v2072_v34 = vadd.f32 %v2040_v54, %v4020_v26 }
 0x219   : > { %v2095_v31 = vadd.f32 %v4078_v20, %v2059_v1  ;;  %v2135_v17 = vmax.f32 %v2103_v39, 0.0 }
 0x21a   : > { %v2108_v47 = vadd.f32 %v4078_v20, %v2072_v34  ;;  %v1965_v15 = vpop.permute.xlu0 %1964 }
 0x21b   : > { %v2127_v50 = vmax.f32 %v2095_v31, 0.0  ;;  %2168 = vst.msk [vmem:[%s4092_s29 + $0x78] sm:$0xff] %vm2152_vm2, %v2135_v17  ;;  %v2038_v37 = vmul.f32 %v4067_v13, %v1965_v15 }
 0x21c   : > { %v2140_v30 = vmax.f32 %v2108_v47, 0.0  ;;  %v1933_v57 = vpop.permute.xlu1 %1932 }
 0x21d   : > { %v1985_v56 = vpop.permute.xlu2 %1984  ;;  %2160 = vst.msk [vmem:[%s4092_s29 + $0x38] sm:$0xff] %vm2152_vm2, %v2127_v50  ;;  %v2030_v25 = vmul.f32 %v4067_v13, %v1933_v57  ;;  %v2070_v26 = vadd.f32 %v2038_v37, %v4043_v29 }
 0x21e   : > { %v2043_v11 = vmul.f32 %v4067_v13, %v1985_v56  ;;  %2173 = vst.msk [vmem:[%s4092_s29 + $0xa0] sm:$0xff] %vm2152_vm2, %v2140_v30 }
 0x21f   : > { %v2062_v35 = vadd.f32 %v2030_v25, %v4032_v51  ;;  %v2106_v6 = vadd.f32 %v4078_v20, %v2070_v26 }
 0x220   : > { %v2075_v28 = vadd.f32 %v2043_v11, %v4035_v43 }
 0x221   : > { %v2098_v53 = vadd.f32 %v4078_v20, %v2062_v35  ;;  %v2138_v33 = vmax.f32 %v2106_v6, 0.0 }
 0x222   : > { %v2111_v27 = vadd.f32 %v4078_v20, %v2075_v28  ;;  %v1977_v4 = vpop.permute.xlu0 %1976 }
 0x223   : > { %v2130_v48 = vmax.f32 %v2098_v53, 0.0  ;;  %2171 = vst.msk [vmem:[%s4092_s29 + $0x90] sm:$0xff] %vm2152_vm2, %v2138_v33  ;;  %v2041_v55 = vmul.f32 %v4067_v13, %v1977_v4 }
 0x224   : > { %v2143_v29 = vmax.f32 %v2111_v27, 0.0  ;;  %v1945_v24 = vpop.permute.xlu1 %1944 }
 0x225   : > { %v1997_v51 = vpop.permute.xlu2 %1996  ;;  %2163 = vst.msk [vmem:[%s4092_s29 + $0x50] sm:$0xff] %vm2152_vm2, %v2130_v48  ;;  %v2033_v10 = vmul.f32 %v4067_v13, %v1945_v24  ;;  %v2073_v43 = vadd.f32 %v2041_v55, %v4057_v22 }
 0x226   : > { %v2046_v8 = vmul.f32 %v4067_v13, %v1997_v51  ;;  %2176 = vst.msk [vmem:[%s4092_s29 + $0xb8] sm:$0xff] %vm2152_vm2, %v2143_v29 }
 0x227   : > { %v2065_v52 = vadd.f32 %v2033_v10, %v4047_v36  ;;  %v2109_v5 = vadd.f32 %v4078_v20, %v2073_v43 }
 0x228   : > { %v2078_v44 = vadd.f32 %v2046_v8, %v4050_v62 }
 0x229   : > { %v2101_v19 = vadd.f32 %v4078_v20, %v2065_v52  ;;  %v2141_v60 = vmax.f32 %v2109_v5, 0.0 }
 0x22a   : > { %v2114_v16 = vadd.f32 %v4078_v20, %v2078_v44  ;;  %v1989_v40 = vpop.permute.xlu0 %1988 }
 0x22b   : > { %v2133_v12 = vmax.f32 %v2101_v19, 0.0  ;;  %2174 = vst.msk [vmem:[%s4092_s29 + $0xa8] sm:$0xff] %vm2152_vm2, %v2141_v60  ;;  %v2044_v7 = vmul.f32 %v4067_v13, %v1989_v40 }
 0x22c   : > { %v2146_v22 = vmax.f32 %v2114_v16, 0.0  ;;  %v1957_v45 = vpop.permute.xlu1 %1956 }
 0x22d   : > { %v2009_v36 = vpop.permute.xlu2 %2008  ;;  %2166 = vst.msk [vmem:[%s4092_s29 + $0x68] sm:$0xff] %vm2152_vm2, %v2133_v12  ;;  %v2036_v32 = vmul.f32 %v4067_v13, %v1957_v45  ;;  %v2076_v62 = vadd.f32 %v2044_v7, %v4073_v58 }
 0x22e   : > { %v2049_v46 = vmul.f32 %v4067_v13, %v2009_v36  ;;  %2179 = vst.msk [vmem:[%s4092_s29 + $0xd0] sm:$0xff] %vm2152_vm2, %v2146_v22 }
 0x22f   : > { %v2068_v9 = vadd.f32 %v2036_v32, %v4061_v2  ;;  %v2112_v42 = vadd.f32 %v4078_v20, %v2076_v62 }
 0x230   : > { %v2081_v38 = vadd.f32 %v2049_v46, %v4064_v61 }
 0x231   : > { %v2104_v41 = vadd.f32 %v4078_v20, %v2068_v9  ;;  %v2144_v14 = vmax.f32 %v2112_v42, 0.0 }
 0x232   : > { %v2117_v21 = vadd.f32 %v4078_v20, %v2081_v38  ;;  %v2001_v54 = vpop.permute.xlu0 %2000 }
 0x233   : > { %v2136_v1 = vmax.f32 %v2104_v41, 0.0  ;;  %2177 = vst.msk [vmem:[%s4092_s29 + $0xc0] sm:$0xff] %vm2152_vm2, %v2144_v14  ;;  %v2047_v39 = vmul.f32 %v4067_v13, %v2001_v54 }
 0x234   : > { %v2149_v58 = vmax.f32 %v2117_v21, 0.0  ;;  %v1969_v34 = vpop.permute.xlu1 %1968 }
 0x235   : > { %2169 = vst.msk [vmem:[%s4092_s29 + $0x80] sm:$0xff] %vm2152_vm2, %v2136_v1  ;;  %v2039_v2 = vmul.f32 %v4067_v13, %v1969_v34  ;;  %v2079_v61 = vadd.f32 %v2047_v39, %v4096_v59 }
 0x236   : > { %2182 = vst.msk [vmem:[%s4092_s29 + $0xe8] sm:$0xff] %vm2152_vm2, %v2149_v58 }
 0x237   : > { %v2071_v31 = vadd.f32 %v2039_v2, %v4082_v3  ;;  %v2115_v17 = vadd.f32 %v4078_v20, %v2079_v61 }
 0x239   : > { %v2107_v47 = vadd.f32 %v4078_v20, %v2071_v31  ;;  %v2147_v15 = vmax.f32 %v2115_v17, 0.0 }
 0x23a   : > { %v2013_v50 = vpop.permute.xlu0 %2012 }
 0x23b   : > { %v2139_v30 = vmax.f32 %v2107_v47, 0.0  ;;  %2180 = vst.msk [vmem:[%s4092_s29 + $0xd8] sm:$0xff] %vm2152_vm2, %v2147_v15  ;;  %v2050_v37 = vmul.f32 %v4067_v13, %v2013_v50 }
 0x23c   : > { %v1981_v57 = vpop.permute.xlu1 %1980 }
 0x23d   : > { %2172 = vst.msk [vmem:[%s4092_s29 + $0x98] sm:$0xff] %vm2152_vm2, %v2139_v30  ;;  %v2042_v59 = vmul.f32 %v4067_v13, %v1981_v57  ;;  %v2082_v3 = vadd.f32 %v2050_v37, %v4109_v18 }
 0x23f   : > { %v2074_v56 = vadd.f32 %v2042_v59, %v4102_v49  ;;  %v2118_v25 = vadd.f32 %v4078_v20, %v2082_v3 }
 0x241   : > { %v2110_v26 = vadd.f32 %v4078_v20, %v2074_v56  ;;  %v2150_v11 = vmax.f32 %v2118_v25, 0.0 }
 0x243   : > { %v2142_v35 = vmax.f32 %v2110_v26, 0.0  ;;  %2183 = vst.msk [vmem:[%s4092_s29 + $0xf0] sm:$0xff] %vm2152_vm2, %v2150_v11 }
 0x244   : > { %v1993_v6 = vpop.permute.xlu1 %1992 }
 0x245   : > { %2175 = vst.msk [vmem:[%s4092_s29 + $0xb0] sm:$0xff] %vm2152_vm2, %v2142_v35  ;;  %v2045_v28 = vmul.f32 %v4067_v13, %v1993_v6 }
 0x247   : > { %v2077_v53 = vadd.f32 %v2045_v28, %v4115_v0 }
 0x249   : > { %v2113_v18 = vadd.f32 %v4078_v20, %v2077_v53 }
 0x24b   : > { %v2145_v49 = vmax.f32 %v2113_v18, 0.0 }
 0x24c   : > { %v2005_v33 = vpop.permute.xlu1 %2004 }
 0x24d   : > { %2178 = vst.msk [vmem:[%s4092_s29 + $0xc8] sm:$0xff] %vm2152_vm2, %v2145_v49  ;;  %v2048_v27 = vmul.f32 %v4067_v13, %v2005_v33 }
 0x24f   : > { %v2080_v4 = vadd.f32 %v2048_v27, %v4126_v23 }
 0x251   : > { %v2116_v48 = vadd.f32 %v4078_v20, %v2080_v4 }
 0x253   : > { %v2148_v29 = vmax.f32 %v2116_v48, 0.0 }
 0x254   : > { %v2017_v55 = vpop.permute.xlu1 %2016 }
 0x255   : > { %2181 = vst.msk [vmem:[%s4092_s29 + $0xe0] sm:$0xff] %vm2152_vm2, %v2148_v29  ;;  %v2051_v24 = vmul.f32 %v4067_v13, %v2017_v55 }
 0x257   : > { %v2083_v0 = vadd.f32 %v2051_v24, %v4140_v63 }
 0x259   : > { %v2119_v51 = vadd.f32 %v4078_v20, %v2083_v0 }
 0x25b   : > { %v2151_v10 = vmax.f32 %v2119_v51, 0.0 }
 0x25d   : > { %2184 = vst.msk [vmem:[%s4092_s29 + $0xf8] sm:$0xff] %vm2152_vm2, %v2151_v10 }
 0x25e PF: > { %s17_s26 = sadd.s32 1, %s2434_s26   ;;  %s4428_s24 = smov %s2430_s25 }
 0x25f   : > { %p14_p5 = scmp.ge.s32.totalorder %s17_s26, 4   ;;  %s4429_s25 = smov %s4431_s27 }
 0x261   :  { %16 = sbr.rel (!%p14_p5) target bundleno = 2 (0x2), region = 88 }

</bundles_post_ra>
